<compile_context>
chip_gen: v7x
topology: tpu7x:2x2x1
jax: 0.10.0
libtpu: 0.0.40
codegen_flags: <defaults>
</compile_context>

<pallas_src>
import functools

import jax
import jax.numpy as jnp
from jax import lax
from jax.experimental import pallas as pl
from jax.experimental.pallas import tpu as pltpu

_NEG = -1e30
_VMEM_LIMIT = 48 * 1024 * 1024  # leaves headroom on v7x's 64 MiB physical VMEM


def _round_up(x, m):
    return ((x + m - 1) // m) * m


def _tile_and_pad(dim, target, align):
    """Return (tile, padded_dim): full dim if small, else an aligned divisor
    <= target, else pad the dim up to a multiple of `target`."""
    if dim <= target:
        return dim, dim
    t = (target // align) * align
    while t >= align:
        if dim % t == 0:
            return t, dim
        t -= align
    return target, _round_up(dim, target)


def _attn_tiles(T, need_weights):
    if T <= 256:
        tq, Tp = T, T
    elif T % 256 == 0:
        tq, Tp = 256, T
    else:
        tq, Tp = 256, _round_up(T, 256)
    # need_weights needs exact (single-pass) softmax -> one KV step.
    tk = Tp if (need_weights or Tp <= 256) else 256
    return tq, tk, Tp


# ---------------------------------------------------------------------------
# Fused QKV projection: q/k/v = x @ Wq_t/Wk_t/Wv_t + b  (x read once per tile)
# ---------------------------------------------------------------------------
def _qkv_proj_kernel(x_ref, wq_ref, wk_ref, wv_ref, bq_ref, bk_ref, bv_ref,
                     q_ref, k_ref, v_ref, accq, acck, accv):
    @pl.when(pl.program_id(2) == 0)
    def _():
        accq[...] = jnp.zeros_like(accq)
        acck[...] = jnp.zeros_like(acck)
        accv[...] = jnp.zeros_like(accv)

    x = x_ref[...]                                            # (bm, bk) bf16
    accq[...] += jnp.dot(x, wq_ref[...], preferred_element_type=jnp.float32)
    acck[...] += jnp.dot(x, wk_ref[...], preferred_element_type=jnp.float32)
    accv[...] += jnp.dot(x, wv_ref[...], preferred_element_type=jnp.float32)

    @pl.when(pl.program_id(2) == pl.num_programs(2) - 1)
    def _():
        q_ref[...] = (accq[...] + bq_ref[...]).astype(q_ref.dtype)
        k_ref[...] = (acck[...] + bk_ref[...]).astype(k_ref.dtype)
        v_ref[...] = (accv[...] + bv_ref[...]).astype(v_ref.dtype)


def qkv_projection(x2d, prep, *, tm=512, tn=512, tkc=512):
    """x2d: (M, E) bf16.  Returns q, k, v each (M, E) bf16."""
    M, E = x2d.shape
    bm, Mp = _tile_and_pad(M, tm, 8)
    bn, Np = _tile_and_pad(E, tn, 128)
    bkc, Kp = _tile_and_pad(E, tkc, 128)

    xp = x2d
    if Mp > M or Kp > E:
        xp = jnp.pad(x2d, ((0, Mp - M), (0, Kp - E)))

    def pad_w(w):  # (E, E) -> (Kp, Np)
        if Kp > E or Np > E:
            return jnp.pad(w, ((0, Kp - E), (0, Np - E)))
        return w

    def pad_b(b):  # (E,) -> (1, Np)
        if Np > E:
            b = jnp.pad(b, ((0, Np - E),))
        return b.reshape(1, Np)

    wq, wk, wv = pad_w(prep["wq_t"]), pad_w(prep["wk_t"]), pad_w(prep["wv_t"])
    bq2, bk2, bv2 = pad_b(prep["bq"]), pad_b(prep["bk"]), pad_b(prep["bv"])

    x_spec = pl.BlockSpec((bm, bkc), lambda i, j, kk: (i, kk))
    w_spec = pl.BlockSpec((bkc, bn), lambda i, j, kk: (kk, j))
    b_spec = pl.BlockSpec((1, bn), lambda i, j, kk: (0, j))
    o_spec = pl.BlockSpec((bm, bn), lambda i, j, kk: (i, j))

    outs = pl.pallas_call(
        _qkv_proj_kernel,
        grid=(Mp // bm, Np // bn, Kp // bkc),
        out_shape=tuple(jax.ShapeDtypeStruct((Mp, Np), jnp.bfloat16)
                        for _ in range(3)),
        in_specs=[x_spec, w_spec, w_spec, w_spec, b_spec, b_spec, b_spec],
        out_specs=(o_spec, o_spec, o_spec),
        scratch_shapes=[pltpu.VMEM((bm, bn), jnp.float32)] * 3,
        compiler_params=pltpu.CompilerParams(
            dimension_semantics=("parallel", "parallel", "arbitrary"),
            vmem_limit_bytes=_VMEM_LIMIT),
    )(xp, wq, wk, wv, bq2, bk2, bv2)

    q, k, v = outs
    if Mp > M or Np > E:
        q, k, v = q[:M, :E], k[:M, :E], v[:M, :E]
    return q, k, v


# ---------------------------------------------------------------------------
# Flash-style attention core with fused output projection.
# grid = (B, num_q_tiles, num_kv_tiles); online softmax state in VMEM scratch.
# ---------------------------------------------------------------------------
def _flash_attn_kernel(*refs, num_heads, head_dim, has_attn_mask, has_kpm,
                       need_weights):
    it = iter(refs)
    q_ref = next(it)                                   # (tq, E)   bf16
    k_ref = next(it)                                   # (tk, E)   bf16
    v_ref = next(it)                                   # (tk, E)   bf16
    am_ref = next(it) if has_attn_mask else None       # (tq, tk)  int8
    km_ref = next(it) if has_kpm else None             # (1, tk)   int8
    ow_ref = next(it)                                  # (H, d, E) bf16 (resident)
    ob_ref = next(it)                                  # (1, E)    f32
    o_ref = next(it)                                   # (tq, E)   f32
    p_ref = next(it) if need_weights else None         # (tq, Tp)  f32
    m_sc = next(it)                                    # (H, tq, 1) f32
    l_sc = next(it)                                    # (H, tq, 1) f32
    acc_sc = next(it)                                  # (H, tq, d) f32

    H, d = num_heads, head_dim
    ki = pl.program_id(2)

    @pl.when(ki == 0)
    def _():
        m_sc[...] = jnp.full_like(m_sc, _NEG)
        l_sc[...] = jnp.zeros_like(l_sc)
        acc_sc[...] = jnp.zeros_like(acc_sc)

    # Additive mask bias for this (q-tile, kv-tile), built on the VPU from the
    # small int8 masks (no (B,T,T) bias in HBM; single -1e30, no -2e30).
    bias = None
    if has_attn_mask:
        bias = am_ref[...].astype(jnp.float32)          # (tq, tk) 0/1
    if has_kpm:
        kmf = km_ref[...].astype(jnp.float32)           # (1, tk)  0/1
        bias = kmf if bias is None else jnp.maximum(bias, kmf)
    if bias is not None:
        bias = bias * _NEG

    for h in range(H):
        sl = slice(h * d, (h + 1) * d)
        q_h = q_ref[:, sl]                              # (tq, d) bf16
        k_h = k_ref[:, sl]                              # (tk, d) bf16
        v_h = v_ref[:, sl]                              # (tk, d) bf16

        s = lax.dot_general(q_h, k_h, (((1,), (1,)), ((), ())),
                            preferred_element_type=jnp.float32)   # (tq, tk)
        if bias is not None:
            s = s + bias

        m_prev = m_sc[h]                                # (tq, 1)
        m_new = jnp.maximum(m_prev, jnp.max(s, axis=-1, keepdims=True))
        alpha = jnp.exp(m_prev - m_new)                 # (tq, 1)
        e = jnp.exp(s - m_new)                          # (tq, tk) f32
        l_new = alpha * l_sc[h] + jnp.sum(e, axis=-1, keepdims=True)

        pv = jnp.dot(e.astype(v_h.dtype), v_h,
                     preferred_element_type=jnp.float32)          # (tq, d)
        acc_sc[h] = alpha * acc_sc[h] + pv
        m_sc[h] = m_new
        l_sc[h] = l_new

        if need_weights:
            # need_weights forces a single KV step, so l_new is final here.
            p_h = (e * pl.reciprocal(l_new)) * (1.0 / H)
            if h == 0:
                p_ref[...] = p_h.astype(p_ref.dtype)
            else:
                p_ref[...] += p_h.astype(p_ref.dtype)

    @pl.when(ki == pl.num_programs(2) - 1)
    def _():
        # Fused output projection: sum_h (ctx_h / l_h) @ out_w_t[h] + out_b.
        out = ob_ref[...].astype(jnp.float32)           # (1, E) -> broadcasts
        for h in range(H):
            ctx = acc_sc[h] * pl.reciprocal(l_sc[h], approx=True)  # (tq, d)
            out = out + jnp.dot(ctx.astype(jnp.bfloat16), ow_ref[h],
                                preferred_element_type=jnp.float32)
        o_ref[...] = out.astype(o_ref.dtype)


def attention_core(q, k, v, attn_mask_i8, kpm_i8, ow, ob, *, num_heads,
                   head_dim, tq, tk, need_weights):
    B, Tp, E = q.shape
    nq, nk = Tp // tq, Tp // tk
    assert not (need_weights and nk != 1)
    has_am = attn_mask_i8 is not None
    has_km = kpm_i8 is not None

    kernel = functools.partial(
        _flash_attn_kernel, num_heads=num_heads, head_dim=head_dim,
        has_attn_mask=has_am, has_kpm=has_km, need_weights=need_weights)

    in_specs = [
        pl.BlockSpec((None, tq, E), lambda b, qi, ki: (b, qi, 0)),   # q
        pl.BlockSpec((None, tk, E), lambda b, qi, ki: (b, ki, 0)),   # k
        pl.BlockSpec((None, tk, E), lambda b, qi, ki: (b, ki, 0)),   # v
    ]
    inputs = [q, k, v]
    if has_am:
        in_specs.append(pl.BlockSpec((tq, tk), lambda b, qi, ki: (qi, ki)))
        inputs.append(attn_mask_i8)
    if has_km:
        in_specs.append(pl.BlockSpec((None, 1, tk), lambda b, qi, ki: (b, 0, ki)))
        inputs.append(kpm_i8)
    # Output-projection weights/bias: same block every step -> stay resident.
    in_specs.append(pl.BlockSpec((num_heads, head_dim, E),
                                 lambda b, qi, ki: (0, 0, 0)))
    inputs.append(ow)
    in_specs.append(pl.BlockSpec((1, E), lambda b, qi, ki: (0, 0)))
    inputs.append(ob)

    o_shape = jax.ShapeDtypeStruct((B, Tp, E), jnp.float32)
    o_spec = pl.BlockSpec((None, tq, E), lambda b, qi, ki: (b, qi, 0))
    if need_weights:
        out_shape = (o_shape, jax.ShapeDtypeStruct((B, Tp, Tp), jnp.float32))
        out_specs = (o_spec,
                     pl.BlockSpec((None, tq, Tp), lambda b, qi, ki: (b, qi, 0)))
    else:
        out_shape = o_shape
        out_specs = o_spec

    scratch = [
        pltpu.VMEM((num_heads, tq, 1), jnp.float32),           # running max
        pltpu.VMEM((num_heads, tq, 1), jnp.float32),           # running denom
        pltpu.VMEM((num_heads, tq, head_dim), jnp.float32),    # per-head context
    ]

    outs = pl.pallas_call(
        kernel,
        grid=(B, nq, nk),
        out_shape=out_shape,
        in_specs=in_specs,
        out_specs=out_specs,
        scratch_shapes=scratch,
        compiler_params=pltpu.CompilerParams(
            dimension_semantics=("parallel", "parallel", "arbitrary"),
            vmem_limit_bytes=_VMEM_LIMIT),
    )(*inputs)

    if need_weights:
        return outs[0], outs[1]
    return outs, None


# ---------------------------------------------------------------------------
# Parameter prep (done once, outside the hot path) and the forward pass.
# ---------------------------------------------------------------------------
def prepare_params(params, num_heads):
    E = params["q_w"].shape[0]
    d = E // num_heads
    scale = float(d) ** -0.5
    return {
        "wq_t": (params["q_w"] * scale).T.astype(jnp.bfloat16),   # (E, E)
        "wk_t": params["k_w"].T.astype(jnp.bfloat16),
        "wv_t": params["v_w"].T.astype(jnp.bfloat16),
        "bq": (params["q_b"] * scale).astype(jnp.float32),
        "bk": params["k_b"].astype(jnp.float32),
        "bv": params["v_b"].astype(jnp.float32),
        # out_w (E,E) PyTorch layout; y = ctx @ out_w.T + out_b, split per head.
        "ow": params["out_w"].T.reshape(num_heads, d, E).astype(jnp.bfloat16),
        "ob": params["out_b"].reshape(1, E).astype(jnp.float32),
    }


def self_attention_forward(x, prep, num_heads, key_padding_mask=None,
                           attn_mask=None, need_weights=True):
    """x: (T, B, E) time-first.  Returns (attn (T,B,E) f32,
    head-averaged attn_weights (B,T,T) f32 or None)."""
    T, B, E = x.shape
    H = num_heads
    d = E // H

    tq, tk, Tp = _attn_tiles(T, need_weights)

    # --- fused QKV projection (x read once, bf16 hand-off) ---
    x_bm = jnp.transpose(x, (1, 0, 2))                       # (B, T, E)
    if Tp > T:
        x_bm = jnp.pad(x_bm, ((0, 0), (0, Tp - T), (0, 0)))
    x2d = x_bm.reshape(B * Tp, E).astype(jnp.bfloat16)
    q, k, v = qkv_projection(x2d, prep)
    q = q.reshape(B, Tp, E)
    k = k.reshape(B, Tp, E)
    v = v.reshape(B, Tp, E)

    # --- small int8 masks; the -1e30 bias is built per tile in-kernel ---
    am_i8 = None
    if attn_mask is not None:                                # (T, T), True = masked
        am_i8 = attn_mask.astype(jnp.int8)
        if Tp > T:
            am_i8 = jnp.pad(am_i8, ((0, Tp - T), (0, Tp - T)))
    kpm_i8 = None
    if key_padding_mask is not None or Tp > T:               # (B, T), True = pad
        km = (key_padding_mask.astype(jnp.int8) if key_padding_mask is not None
              else jnp.zeros((B, T), jnp.int8))
        if Tp > T:
            km = jnp.pad(km, ((0, 0), (0, Tp - T)), constant_values=1)
        kpm_i8 = km.reshape(B, 1, Tp)

    out, probs = attention_core(
        q, k, v, am_i8, kpm_i8, prep["ow"], prep["ob"],
        num_heads=H, head_dim=d, tq=tq, tk=tk, need_weights=need_weights)

    attn = out[:, :T, :].transpose(1, 0, 2)                  # (T, B, E)
    if need_weights:
        probs = probs[:, :T, :T]
    return attn, probs


# ---------------------------------------------------------------------------
# Pure-JAX reference (f32, same semantics) and a small self-test.
# ---------------------------------------------------------------------------
def _reference_forward(x, params, num_heads, key_padding_mask=None,
                       attn_mask=None):
    T, B, E = x.shape
    H = num_heads
    d = E // H
    scale = float(d) ** -0.5

    def lin(a, w, b):
        return a @ w.T + b

    q = lin(x, params["q_w"], params["q_b"]) * scale
    k = lin(x, params["k_w"], params["k_b"])
    v = lin(x, params["v_w"], params["v_b"])

    def split(a):  # (T,B,E) -> (B,H,T,d)
        return a.reshape(T, B, H, d).transpose(1, 2, 0, 3)

    qh, kh, vh = split(q), split(k), split(v)
    s = jnp.einsum("bhqd,bhkd->bhqk", qh, kh)
    if attn_mask is not None:
        s = jnp.where(attn_mask[None, None], _NEG, s)
    if key_padding_mask is not None:
        s = jnp.where(key_padding_mask[:, None, None, :], _NEG, s)
    p = jax.nn.softmax(s, axis=-1)
    ctx = jnp.einsum("bhqk,bhkd->bhqd", p, vh)
    ctx = ctx.transpose(0, 2, 1, 3).reshape(B, T, E)
    out = lin(ctx, params["out_w"], params["out_b"])         # (B, T, E)
    return out.transpose(1, 0, 2), p.mean(axis=1)


def init_params(key, embed_dim):
    ks = jax.random.split(key, 8)
    E = embed_dim
    s = 1.0 / jnp.sqrt(E)
    return {
        "q_w": jax.random.normal(ks[0], (E, E), jnp.float32) * s,
        "q_b": jax.random.normal(ks[1], (E,), jnp.float32) * 0.01,
        "k_w": jax.random.normal(ks[2], (E, E), jnp.float32) * s,
        "k_b": jax.random.normal(ks[3], (E,), jnp.float32) * 0.01,
        "v_w": jax.random.normal(ks[4], (E, E), jnp.float32) * s,
        "v_b": jax.random.normal(ks[5], (E,), jnp.float32) * 0.01,
        "out_w": jax.random.normal(ks[6], (E, E), jnp.float32) * s,
        "out_b": jax.random.normal(ks[7], (E,), jnp.float32) * 0.01,
    }


if __name__ == "__main__":
    T, B, E, H = 8, 2, 32, 4
    key = jax.random.PRNGKey(0)
    k_params, k_x = jax.random.split(key)
    params = init_params(k_params, E)
    prep = prepare_params(params, H)         # hoisted weight prep (done once)
    x = jax.random.normal(k_x, (T, B, E), jnp.float32)

    forward = jax.jit(self_attention_forward, static_argnums=(2,),
                      static_argnames=("need_weights",))

    # --- unmasked path ---
    attn, attn_w = forward(x, prep, H)
    jax.block_until_ready((attn, attn_w))
    assert attn.shape == (T, B, E)
    assert attn_w.shape == (B, T, T)
    assert bool(jnp.all(jnp.isfinite(attn)))
    assert bool(jnp.allclose(attn_w.sum(-1), 1.0, atol=1e-3))
    ref_attn, ref_w = _reference_forward(x, params, H)
    assert bool(jnp.allclose(attn, ref_attn, atol=5e-2, rtol=5e-2))
    assert bool(jnp.allclose(attn_w, ref_w, atol=5e-2))

    # --- causal attn_mask + key_padding_mask path ---
    causal = jnp.triu(jnp.ones((T, T), dtype=bool), k=1)
    kpm = jnp.zeros((B, T), dtype=bool).at[:, T - 1].set(True)
    attn_c, w_c = forward(x, prep, H, kpm, causal)
    jax.block_until_ready((attn_c, w_c))
    assert bool(jnp.all(jnp.isfinite(attn_c)))
    assert bool(jnp.allclose(w_c.sum(-1), 1.0, atol=1e-3))
    assert float(jnp.max(jnp.where(causal[None], w_c, 0.0))) < 1e-6  # future masked
    assert float(jnp.max(w_c[:, 1:, T - 1])) < 1e-6                  # padded key masked
    ref_attn_c, ref_w_c = _reference_forward(x, params, H, kpm, causal)
    assert bool(jnp.allclose(attn_c, ref_attn_c, atol=5e-2, rtol=5e-2))
    assert bool(jnp.allclose(w_c, ref_w_c, atol=5e-2))

    # --- flash path (no weights requested) matches the weighted path ---
    attn_f, w_f = forward(x, prep, H, kpm, causal, need_weights=False)
    jax.block_until_ready(attn_f)
    assert w_f is None
    assert bool(jnp.allclose(attn_f, attn_c, atol=1e-4, rtol=1e-4))

    print("KERNEL_OK")
</pallas_src>

<mosaic_0001>
module attributes {stable_mosaic.version = 11 : i64} {
  func.func @_qkv_proj_kernel(%arg0: i32, %arg1: i32, %arg2: i32, %arg3: memref<16x32xbf16, #tpu.memory_space<vmem>>, %arg4: memref<32x32xbf16, #tpu.memory_space<vmem>>, %arg5: memref<32x32xbf16, #tpu.memory_space<vmem>>, %arg6: memref<32x32xbf16, #tpu.memory_space<vmem>>, %arg7: memref<1x32xf32, #tpu.memory_space<vmem>>, %arg8: memref<1x32xf32, #tpu.memory_space<vmem>>, %arg9: memref<1x32xf32, #tpu.memory_space<vmem>>, %arg10: memref<16x32xbf16, #tpu.memory_space<vmem>>, %arg11: memref<16x32xbf16, #tpu.memory_space<vmem>>, %arg12: memref<16x32xbf16, #tpu.memory_space<vmem>>, %arg13: memref<16x32xf32, #tpu.memory_space<vmem>>, %arg14: memref<16x32xf32, #tpu.memory_space<vmem>>, %arg15: memref<16x32xf32, #tpu.memory_space<vmem>>) attributes {dimension_semantics = [#tpu.dimension_semantics<parallel>, #tpu.dimension_semantics<parallel>, #tpu.dimension_semantics<arbitrary>], iteration_bounds = array<i64: 1, 1, 1>, scalar_prefetch = 0 : i64, scratch_operands = 3 : i64, tpu.core_type = #tpu.core_type<tc>, window_params = [{transform_indices = @transform_0, window_bounds = array<i64: 16, 32>}, {transform_indices = @transform_1, window_bounds = array<i64: 32, 32>}, {transform_indices = @transform_2, window_bounds = array<i64: 32, 32>}, {transform_indices = @transform_3, window_bounds = array<i64: 32, 32>}, {transform_indices = @transform_4, window_bounds = array<i64: 1, 32>}, {transform_indices = @transform_5, window_bounds = array<i64: 1, 32>}, {transform_indices = @transform_6, window_bounds = array<i64: 1, 32>}, {transform_indices = @transform_7, window_bounds = array<i64: 16, 32>}, {transform_indices = @transform_8, window_bounds = array<i64: 16, 32>}, {transform_indices = @transform_9, window_bounds = array<i64: 16, 32>}]} {
    %c0_i32 = arith.constant 0 : i32
    %0 = arith.cmpi eq, %arg2, %c0_i32 : i32
    %1 = arith.extui %0 : i1 to i32
    %c0_i32_0 = arith.constant 0 : i32
    %2 = arith.cmpi ne, %1, %c0_i32_0 : i32
    scf.if %2 {
      %cst_24 = arith.constant 0.000000e+00 : f32
      %22 = vector.broadcast %cst_24 : f32 to vector<16x32xf32>
      %c0_25 = arith.constant 0 : index
      %c0_26 = arith.constant 0 : index
      %23 = vector.load %arg13[%c0_25, %c0_26] : memref<16x32xf32, #tpu.memory_space<vmem>>, vector<16x32xf32>
      tpu.vector_store %arg13[%c0_25, %c0_26], %22 {strides = array<i32>} : memref<16x32xf32, #tpu.memory_space<vmem>>, vector<16x32xf32>,
      %cst_27 = arith.constant 0.000000e+00 : f32
      %24 = vector.broadcast %cst_27 : f32 to vector<16x32xf32>
      %c0_28 = arith.constant 0 : index
      %c0_29 = arith.constant 0 : index
      %25 = vector.load %arg14[%c0_28, %c0_29] : memref<16x32xf32, #tpu.memory_space<vmem>>, vector<16x32xf32>
      tpu.vector_store %arg14[%c0_28, %c0_29], %24 {strides = array<i32>} : memref<16x32xf32, #tpu.memory_space<vmem>>, vector<16x32xf32>,
      %cst_30 = arith.constant 0.000000e+00 : f32
      %26 = vector.broadcast %cst_30 : f32 to vector<16x32xf32>
      %c0_31 = arith.constant 0 : index
      %c0_32 = arith.constant 0 : index
      %27 = vector.load %arg15[%c0_31, %c0_32] : memref<16x32xf32, #tpu.memory_space<vmem>>, vector<16x32xf32>
      tpu.vector_store %arg15[%c0_31, %c0_32], %26 {strides = array<i32>} : memref<16x32xf32, #tpu.memory_space<vmem>>, vector<16x32xf32>,
    } else {
    }
    %c0 = arith.constant 0 : index
    %c0_1 = arith.constant 0 : index
    %3 = vector.load %arg3[%c0, %c0_1] : memref<16x32xbf16, #tpu.memory_space<vmem>>, vector<16x32xbf16>
    %c0_2 = arith.constant 0 : index
    %c0_3 = arith.constant 0 : index
    %4 = vector.load %arg13[%c0_2, %c0_3] : memref<16x32xf32, #tpu.memory_space<vmem>>, vector<16x32xf32>
    %c0_4 = arith.constant 0 : index
    %c0_5 = arith.constant 0 : index
    %5 = vector.load %arg4[%c0_4, %c0_5] : memref<32x32xbf16, #tpu.memory_space<vmem>>, vector<32x32xbf16>
    %cst = arith.constant dense<0.000000e+00> : vector<16x32xf32>
    %6 = tpu.matmul %3, %5, %cst {dimension_numbers = #tpu.dot_dimension_numbers<[1], [0], [0], [1], [0, 0, 1, 1], [], []>} : vector<16x32xbf16>, vector<32x32xbf16>, vector<16x32xf32> -> vector<16x32xf32>
    %7 = arith.addf %4, %6 : vector<16x32xf32>
    %c0_6 = arith.constant 0 : index
    %c0_7 = arith.constant 0 : index
    %8 = vector.load %arg13[%c0_6, %c0_7] : memref<16x32xf32, #tpu.memory_space<vmem>>, vector<16x32xf32>
    tpu.vector_store %arg13[%c0_6, %c0_7], %7 {strides = array<i32>} : memref<16x32xf32, #tpu.memory_space<vmem>>, vector<16x32xf32>,
    %c0_8 = arith.constant 0 : index
    %c0_9 = arith.constant 0 : index
    %9 = vector.load %arg14[%c0_8, %c0_9] : memref<16x32xf32, #tpu.memory_space<vmem>>, vector<16x32xf32>
    %c0_10 = arith.constant 0 : index
    %c0_11 = arith.constant 0 : index
    %10 = vector.load %arg5[%c0_10, %c0_11] : memref<32x32xbf16, #tpu.memory_space<vmem>>, vector<32x32xbf16>
    %cst_12 = arith.constant dense<0.000000e+00> : vector<16x32xf32>
    %11 = tpu.matmul %3, %10, %cst_12 {dimension_numbers = #tpu.dot_dimension_numbers<[1], [0], [0], [1], [0, 0, 1, 1], [], []>} : vector<16x32xbf16>, vector<32x32xbf16>, vector<16x32xf32> -> vector<16x32xf32>
    %12 = arith.addf %9, %11 : vector<16x32xf32>
    %c0_13 = arith.constant 0 : index
    %c0_14 = arith.constant 0 : index
    %13 = vector.load %arg14[%c0_13, %c0_14] : memref<16x32xf32, #tpu.memory_space<vmem>>, vector<16x32xf32>
    tpu.vector_store %arg14[%c0_13, %c0_14], %12 {strides = array<i32>} : memref<16x32xf32, #tpu.memory_space<vmem>>, vector<16x32xf32>,
    %c0_15 = arith.constant 0 : index
    %c0_16 = arith.constant 0 : index
    %14 = vector.load %arg15[%c0_15, %c0_16] : memref<16x32xf32, #tpu.memory_space<vmem>>, vector<16x32xf32>
    %c0_17 = arith.constant 0 : index
    %c0_18 = arith.constant 0 : index
    %15 = vector.load %arg6[%c0_17, %c0_18] : memref<32x32xbf16, #tpu.memory_space<vmem>>, vector<32x32xbf16>
    %cst_19 = arith.constant dense<0.000000e+00> : vector<16x32xf32>
    %16 = tpu.matmul %3, %15, %cst_19 {dimension_numbers = #tpu.dot_dimension_numbers<[1], [0], [0], [1], [0, 0, 1, 1], [], []>} : vector<16x32xbf16>, vector<32x32xbf16>, vector<16x32xf32> -> vector<16x32xf32>
    %17 = arith.addf %14, %16 : vector<16x32xf32>
    %c0_20 = arith.constant 0 : index
    %c0_21 = arith.constant 0 : index
    %18 = vector.load %arg15[%c0_20, %c0_21] : memref<16x32xf32, #tpu.memory_space<vmem>>, vector<16x32xf32>
    tpu.vector_store %arg15[%c0_20, %c0_21], %17 {strides = array<i32>} : memref<16x32xf32, #tpu.memory_space<vmem>>, vector<16x32xf32>,
    %c0_i32_22 = arith.constant 0 : i32
    %19 = arith.cmpi eq, %arg2, %c0_i32_22 : i32
    %20 = arith.extui %19 : i1 to i32
    %c0_i32_23 = arith.constant 0 : i32
    %21 = arith.cmpi ne, %20, %c0_i32_23 : i32
    scf.if %21 {
      %c0_24 = arith.constant 0 : index
      %c0_25 = arith.constant 0 : index
      %22 = vector.load %arg13[%c0_24, %c0_25] : memref<16x32xf32, #tpu.memory_space<vmem>>, vector<16x32xf32>
      %c0_26 = arith.constant 0 : index
      %c0_27 = arith.constant 0 : index
      %23 = vector.load %arg7[%c0_26, %c0_27] : memref<1x32xf32, #tpu.memory_space<vmem>>, vector<1x32xf32>
      %24 = vector.broadcast %23 : vector<1x32xf32> to vector<16x32xf32>
      %25 = arith.addf %22, %24 : vector<16x32xf32>
      %26 = arith.truncf %25 : vector<16x32xf32> to vector<16x32xbf16>
      %c0_28 = arith.constant 0 : index
      %c0_29 = arith.constant 0 : index
      %27 = vector.load %arg10[%c0_28, %c0_29] : memref<16x32xbf16, #tpu.memory_space<vmem>>, vector<16x32xbf16>
      tpu.vector_store %arg10[%c0_28, %c0_29], %26 {strides = array<i32>} : memref<16x32xbf16, #tpu.memory_space<vmem>>, vector<16x32xbf16>,
      %c0_30 = arith.constant 0 : index
      %c0_31 = arith.constant 0 : index
      %28 = vector.load %arg14[%c0_30, %c0_31] : memref<16x32xf32, #tpu.memory_space<vmem>>, vector<16x32xf32>
      %c0_32 = arith.constant 0 : index
      %c0_33 = arith.constant 0 : index
      %29 = vector.load %arg8[%c0_32, %c0_33] : memref<1x32xf32, #tpu.memory_space<vmem>>, vector<1x32xf32>
      %30 = vector.broadcast %29 : vector<1x32xf32> to vector<16x32xf32>
      %31 = arith.addf %28, %30 : vector<16x32xf32>
      %32 = arith.truncf %31 : vector<16x32xf32> to vector<16x32xbf16>
      %c0_34 = arith.constant 0 : index
      %c0_35 = arith.constant 0 : index
      %33 = vector.load %arg11[%c0_34, %c0_35] : memref<16x32xbf16, #tpu.memory_space<vmem>>, vector<16x32xbf16>
      tpu.vector_store %arg11[%c0_34, %c0_35], %32 {strides = array<i32>} : memref<16x32xbf16, #tpu.memory_space<vmem>>, vector<16x32xbf16>,
      %c0_36 = arith.constant 0 : index
      %c0_37 = arith.constant 0 : index
      %34 = vector.load %arg15[%c0_36, %c0_37] : memref<16x32xf32, #tpu.memory_space<vmem>>, vector<16x32xf32>
      %c0_38 = arith.constant 0 : index
      %c0_39 = arith.constant 0 : index
      %35 = vector.load %arg9[%c0_38, %c0_39] : memref<1x32xf32, #tpu.memory_space<vmem>>, vector<1x32xf32>
      %36 = vector.broadcast %35 : vector<1x32xf32> to vector<16x32xf32>
      %37 = arith.addf %34, %36 : vector<16x32xf32>
      %38 = arith.truncf %37 : vector<16x32xf32> to vector<16x32xbf16>
      %c0_40 = arith.constant 0 : index
      %c0_41 = arith.constant 0 : index
      %39 = vector.load %arg12[%c0_40, %c0_41] : memref<16x32xbf16, #tpu.memory_space<vmem>>, vector<16x32xbf16>
      tpu.vector_store %arg12[%c0_40, %c0_41], %38 {strides = array<i32>} : memref<16x32xbf16, #tpu.memory_space<vmem>>, vector<16x32xbf16>,
    } else {
    }
    return
  }
  func.func @transform_0(%arg0: i32, %arg1: i32, %arg2: i32) -> (i32, i32) {
    %c0_i32 = arith.constant 0 : i32
    return %arg0, %arg2 : i32, i32
  }
  func.func @transform_1(%arg0: i32, %arg1: i32, %arg2: i32) -> (i32, i32) {
    %c0_i32 = arith.constant 0 : i32
    return %arg2, %arg1 : i32, i32
  }
  func.func @transform_2(%arg0: i32, %arg1: i32, %arg2: i32) -> (i32, i32) {
    %c0_i32 = arith.constant 0 : i32
    return %arg2, %arg1 : i32, i32
  }
  func.func @transform_3(%arg0: i32, %arg1: i32, %arg2: i32) -> (i32, i32) {
    %c0_i32 = arith.constant 0 : i32
    return %arg2, %arg1 : i32, i32
  }
  func.func @transform_4(%arg0: i32, %arg1: i32, %arg2: i32) -> (i32, i32) {
    %c0_i32 = arith.constant 0 : i32
    %c0_i32_0 = arith.constant 0 : i32
    return %c0_i32, %arg1 : i32, i32
  }
  func.func @transform_5(%arg0: i32, %arg1: i32, %arg2: i32) -> (i32, i32) {
    %c0_i32 = arith.constant 0 : i32
    %c0_i32_0 = arith.constant 0 : i32
    return %c0_i32, %arg1 : i32, i32
  }
  func.func @transform_6(%arg0: i32, %arg1: i32, %arg2: i32) -> (i32, i32) {
    %c0_i32 = arith.constant 0 : i32
    %c0_i32_0 = arith.constant 0 : i32
    return %c0_i32, %arg1 : i32, i32
  }
  func.func @transform_7(%arg0: i32, %arg1: i32, %arg2: i32) -> (i32, i32) {
    %c0_i32 = arith.constant 0 : i32
    return %arg0, %arg1 : i32, i32
  }
  func.func @transform_8(%arg0: i32, %arg1: i32, %arg2: i32) -> (i32, i32) {
    %c0_i32 = arith.constant 0 : i32
    return %arg0, %arg1 : i32, i32
  }
  func.func @transform_9(%arg0: i32, %arg1: i32, %arg2: i32) -> (i32, i32) {
    %c0_i32 = arith.constant 0 : i32
    return %arg0, %arg1 : i32, i32
  }
}

module attributes {stable_mosaic.version = 11 : i64} {
  func.func @_flash_attn_kernel(%arg0: i32, %arg1: i32, %arg2: i32, %arg3: memref<1x8x32xbf16, #tpu.memory_space<vmem>>, %arg4: memref<1x8x32xbf16, #tpu.memory_space<vmem>>, %arg5: memref<1x8x32xbf16, #tpu.memory_space<vmem>>, %arg6: memref<4x8x32xbf16, #tpu.memory_space<vmem>>, %arg7: memref<1x32xf32, #tpu.memory_space<vmem>>, %arg8: memref<1x8x32xf32, #tpu.memory_space<vmem>>, %arg9: memref<1x8x8xf32, #tpu.memory_space<vmem>>, %arg10: memref<4x8x1xf32, #tpu.memory_space<vmem>>, %arg11: memref<4x8x1xf32, #tpu.memory_space<vmem>>, %arg12: memref<4x8x8xf32, #tpu.memory_space<vmem>>) attributes {dimension_semantics = [#tpu.dimension_semantics<parallel>, #tpu.dimension_semantics<parallel>, #tpu.dimension_semantics<arbitrary>], iteration_bounds = array<i64: 2, 1, 1>, scalar_prefetch = 0 : i64, scratch_operands = 3 : i64, tpu.core_type = #tpu.core_type<tc>, window_params = [{transform_indices = @transform_0, window_bounds = array<i64: 1, 8, 32>}, {transform_indices = @transform_1, window_bounds = array<i64: 1, 8, 32>}, {transform_indices = @transform_2, window_bounds = array<i64: 1, 8, 32>}, {pipeline_mode = #tpu.pipeline_mode<synchronous>, transform_indices = @transform_3, window_bounds = array<i64: 4, 8, 32>}, {pipeline_mode = #tpu.pipeline_mode<synchronous>, transform_indices = @transform_4, window_bounds = array<i64: 1, 32>}, {transform_indices = @transform_5, window_bounds = array<i64: 1, 8, 32>}, {transform_indices = @transform_6, window_bounds = array<i64: 1, 8, 8>}]} {
    %c0_i32 = arith.constant 0 : i32
    %0 = arith.cmpi eq, %arg2, %c0_i32 : i32
    %1 = arith.extui %0 : i1 to i32
    %c0_i32_0 = arith.constant 0 : i32
    %2 = arith.cmpi ne, %1, %c0_i32_0 : i32
    scf.if %2 {
      %cst_144 = arith.constant -1.000000e+30 : f32
      %203 = vector.broadcast %cst_144 : f32 to vector<4x8x1xf32>
      %c0_145 = arith.constant 0 : index
      %c0_146 = arith.constant 0 : index
      %c0_147 = arith.constant 0 : index
      %204 = vector.load %arg10[%c0_145, %c0_146, %c0_147] : memref<4x8x1xf32, #tpu.memory_space<vmem>>, vector<4x8x1xf32>
      tpu.vector_store %arg10[%c0_145, %c0_146, %c0_147], %203 {strides = array<i32>} : memref<4x8x1xf32, #tpu.memory_space<vmem>>, vector<4x8x1xf32>,
      %cst_148 = arith.constant 0.000000e+00 : f32
      %205 = vector.broadcast %cst_148 : f32 to vector<4x8x1xf32>
      %c0_149 = arith.constant 0 : index
      %c0_150 = arith.constant 0 : index
      %c0_151 = arith.constant 0 : index
      %206 = vector.load %arg11[%c0_149, %c0_150, %c0_151] : memref<4x8x1xf32, #tpu.memory_space<vmem>>, vector<4x8x1xf32>
      tpu.vector_store %arg11[%c0_149, %c0_150, %c0_151], %205 {strides = array<i32>} : memref<4x8x1xf32, #tpu.memory_space<vmem>>, vector<4x8x1xf32>,
      %cst_152 = arith.constant 0.000000e+00 : f32
      %207 = vector.broadcast %cst_152 : f32 to vector<4x8x8xf32>
      %c0_153 = arith.constant 0 : index
      %c0_154 = arith.constant 0 : index
      %c0_155 = arith.constant 0 : index
      %208 = vector.load %arg12[%c0_153, %c0_154, %c0_155] : memref<4x8x8xf32, #tpu.memory_space<vmem>>, vector<4x8x8xf32>
      tpu.vector_store %arg12[%c0_153, %c0_154, %c0_155], %207 {strides = array<i32>} : memref<4x8x8xf32, #tpu.memory_space<vmem>>, vector<4x8x8xf32>,
    } else {
    }
    %c0 = arith.constant 0 : index
    %c0_1 = arith.constant 0 : index
    %c0_2 = arith.constant 0 : index
    %3 = vector.load %arg3[%c0, %c0_1, %c0_2] : memref<1x8x32xbf16, #tpu.memory_space<vmem>>, vector<1x8x8xbf16>
    %4 = vector.shape_cast %3 : vector<1x8x8xbf16> to vector<8x8xbf16>
    %c0_3 = arith.constant 0 : index
    %c0_4 = arith.constant 0 : index
    %c0_5 = arith.constant 0 : index
    %5 = vector.load %arg4[%c0_3, %c0_4, %c0_5] : memref<1x8x32xbf16, #tpu.memory_space<vmem>>, vector<1x8x8xbf16>
    %6 = vector.shape_cast %5 : vector<1x8x8xbf16> to vector<8x8xbf16>
    %c0_6 = arith.constant 0 : index
    %c0_7 = arith.constant 0 : index
    %c0_8 = arith.constant 0 : index
    %7 = vector.load %arg5[%c0_6, %c0_7, %c0_8] : memref<1x8x32xbf16, #tpu.memory_space<vmem>>, vector<1x8x8xbf16>
    %8 = vector.shape_cast %7 : vector<1x8x8xbf16> to vector<8x8xbf16>
    %cst = arith.constant dense<0.000000e+00> : vector<8x8xf32>
    %9 = tpu.matmul %4, %6, %cst {dimension_numbers = #tpu.dot_dimension_numbers<[1], [1], [0], [0], [0, 0, 1, 0], [], []>} : vector<8x8xbf16>, vector<8x8xbf16>, vector<8x8xf32> -> vector<8x8xf32>
    %c0_9 = arith.constant 0 : index
    %c0_10 = arith.constant 0 : index
    %c0_11 = arith.constant 0 : index
    %10 = vector.load %arg10[%c0_9, %c0_10, %c0_11] : memref<4x8x1xf32, #tpu.memory_space<vmem>>, vector<1x8x1xf32>
    %11 = vector.shape_cast %10 : vector<1x8x1xf32> to vector<8x1xf32>
    %cst_12 = arith.constant dense<0xFF800000> : vector<8xf32>
    %12 = vector.multi_reduction <maximumf>, %9, %cst_12 [1] : vector<8x8xf32> to vector<8xf32>
    %13 = vector.shape_cast %12 : vector<8xf32> to vector<8x1xf32>
    %14 = arith.maximumf %11, %13 : vector<8x1xf32>
    %15 = arith.subf %11, %14 : vector<8x1xf32>
    %16 = math.exp %15 : vector<8x1xf32>
    %17 = vector.broadcast %14 : vector<8x1xf32> to vector<8x8xf32>
    %18 = arith.subf %9, %17 : vector<8x8xf32>
    %19 = math.exp %18 : vector<8x8xf32>
    %c0_13 = arith.constant 0 : index
    %c0_14 = arith.constant 0 : index
    %c0_15 = arith.constant 0 : index
    %20 = vector.load %arg11[%c0_13, %c0_14, %c0_15] : memref<4x8x1xf32, #tpu.memory_space<vmem>>, vector<1x8x1xf32>
    %21 = vector.shape_cast %20 : vector<1x8x1xf32> to vector<8x1xf32>
    %22 = arith.mulf %16, %21 : vector<8x1xf32>
    %cst_16 = arith.constant dense<0.000000e+00> : vector<8xf32>
    %23 = vector.multi_reduction <add>, %19, %cst_16 [1] : vector<8x8xf32> to vector<8xf32>
    %24 = vector.shape_cast %23 : vector<8xf32> to vector<8x1xf32>
    %25 = arith.addf %22, %24 : vector<8x1xf32>
    %26 = arith.truncf %19 : vector<8x8xf32> to vector<8x8xbf16>
    %cst_17 = arith.constant dense<0.000000e+00> : vector<8x8xf32>
    %27 = tpu.matmul %26, %8, %cst_17 {dimension_numbers = #tpu.dot_dimension_numbers<[1], [0], [0], [1], [0, 0, 1, 1], [], []>} : vector<8x8xbf16>, vector<8x8xbf16>, vector<8x8xf32> -> vector<8x8xf32>
    %c0_18 = arith.constant 0 : index
    %c0_19 = arith.constant 0 : index
    %c0_20 = arith.constant 0 : index
    %28 = vector.load %arg12[%c0_18, %c0_19, %c0_20] : memref<4x8x8xf32, #tpu.memory_space<vmem>>, vector<1x8x8xf32>
    %29 = vector.shape_cast %28 : vector<1x8x8xf32> to vector<8x8xf32>
    %30 = vector.broadcast %16 : vector<8x1xf32> to vector<8x8xf32>
    %31 = arith.mulf %30, %29 : vector<8x8xf32>
    %32 = arith.addf %31, %27 : vector<8x8xf32>
    %c0_21 = arith.constant 0 : index
    %c0_22 = arith.constant 0 : index
    %c0_23 = arith.constant 0 : index
    %33 = vector.load %arg12[%c0_21, %c0_22, %c0_23] : memref<4x8x8xf32, #tpu.memory_space<vmem>>, vector<1x8x8xf32>
    %34 = vector.shape_cast %33 : vector<1x8x8xf32> to vector<8x8xf32>
    %35 = vector.shape_cast %32 : vector<8x8xf32> to vector<1x8x8xf32>
    tpu.vector_store %arg12[%c0_21, %c0_22, %c0_23], %35 {strides = array<i32>} : memref<4x8x8xf32, #tpu.memory_space<vmem>>, vector<1x8x8xf32>,
    %c0_24 = arith.constant 0 : index
    %c0_25 = arith.constant 0 : index
    %c0_26 = arith.constant 0 : index
    %36 = vector.load %arg10[%c0_24, %c0_25, %c0_26] : memref<4x8x1xf32, #tpu.memory_space<vmem>>, vector<1x8x1xf32>
    %37 = vector.shape_cast %36 : vector<1x8x1xf32> to vector<8x1xf32>
    %38 = vector.shape_cast %14 : vector<8x1xf32> to vector<1x8x1xf32>
    tpu.vector_store %arg10[%c0_24, %c0_25, %c0_26], %38 {strides = array<i32>} : memref<4x8x1xf32, #tpu.memory_space<vmem>>, vector<1x8x1xf32>,
    %c0_27 = arith.constant 0 : index
    %c0_28 = arith.constant 0 : index
    %c0_29 = arith.constant 0 : index
    %39 = vector.load %arg11[%c0_27, %c0_28, %c0_29] : memref<4x8x1xf32, #tpu.memory_space<vmem>>, vector<1x8x1xf32>
    %40 = vector.shape_cast %39 : vector<1x8x1xf32> to vector<8x1xf32>
    %41 = vector.shape_cast %25 : vector<8x1xf32> to vector<1x8x1xf32>
    tpu.vector_store %arg11[%c0_27, %c0_28, %c0_29], %41 {strides = array<i32>} : memref<4x8x1xf32, #tpu.memory_space<vmem>>, vector<1x8x1xf32>,
    %42 = tpu.reciprocal %25 : vector<8x1xf32> -> vector<8x1xf32>
    %43 = vector.broadcast %42 : vector<8x1xf32> to vector<8x8xf32>
    %44 = arith.mulf %19, %43 : vector<8x8xf32>
    %cst_30 = arith.constant 2.500000e-01 : f32
    %45 = vector.broadcast %cst_30 : f32 to vector<8x8xf32>
    %46 = arith.mulf %44, %45 : vector<8x8xf32>
    %c0_31 = arith.constant 0 : index
    %c0_32 = arith.constant 0 : index
    %c0_33 = arith.constant 0 : index
    %47 = vector.load %arg9[%c0_31, %c0_32, %c0_33] : memref<1x8x8xf32, #tpu.memory_space<vmem>>, vector<1x8x8xf32>
    %48 = vector.shape_cast %47 : vector<1x8x8xf32> to vector<8x8xf32>
    %49 = vector.shape_cast %46 : vector<8x8xf32> to vector<1x8x8xf32>
    tpu.vector_store %arg9[%c0_31, %c0_32, %c0_33], %49 {strides = array<i32>} : memref<1x8x8xf32, #tpu.memory_space<vmem>>, vector<1x8x8xf32>,
    %c0_34 = arith.constant 0 : index
    %c0_35 = arith.constant 0 : index
    %c8 = arith.constant 8 : index
    %50 = vector.load %arg3[%c0_34, %c0_35, %c8] : memref<1x8x32xbf16, #tpu.memory_space<vmem>>, vector<1x8x8xbf16>
    %51 = vector.shape_cast %50 : vector<1x8x8xbf16> to vector<8x8xbf16>
    %c0_36 = arith.constant 0 : index
    %c0_37 = arith.constant 0 : index
    %c8_38 = arith.constant 8 : index
    %52 = vector.load %arg4[%c0_36, %c0_37, %c8_38] : memref<1x8x32xbf16, #tpu.memory_space<vmem>>, vector<1x8x8xbf16>
    %53 = vector.shape_cast %52 : vector<1x8x8xbf16> to vector<8x8xbf16>
    %c0_39 = arith.constant 0 : index
    %c0_40 = arith.constant 0 : index
    %c8_41 = arith.constant 8 : index
    %54 = vector.load %arg5[%c0_39, %c0_40, %c8_41] : memref<1x8x32xbf16, #tpu.memory_space<vmem>>, vector<1x8x8xbf16>
    %55 = vector.shape_cast %54 : vector<1x8x8xbf16> to vector<8x8xbf16>
    %cst_42 = arith.constant dense<0.000000e+00> : vector<8x8xf32>
    %56 = tpu.matmul %51, %53, %cst_42 {dimension_numbers = #tpu.dot_dimension_numbers<[1], [1], [0], [0], [0, 0, 1, 0], [], []>} : vector<8x8xbf16>, vector<8x8xbf16>, vector<8x8xf32> -> vector<8x8xf32>
    %c1 = arith.constant 1 : index
    %c0_43 = arith.constant 0 : index
    %c0_44 = arith.constant 0 : index
    %57 = vector.load %arg10[%c1, %c0_43, %c0_44] : memref<4x8x1xf32, #tpu.memory_space<vmem>>, vector<1x8x1xf32>
    %58 = vector.shape_cast %57 : vector<1x8x1xf32> to vector<8x1xf32>
    %cst_45 = arith.constant dense<0xFF800000> : vector<8xf32>
    %59 = vector.multi_reduction <maximumf>, %56, %cst_45 [1] : vector<8x8xf32> to vector<8xf32>
    %60 = vector.shape_cast %59 : vector<8xf32> to vector<8x1xf32>
    %61 = arith.maximumf %58, %60 : vector<8x1xf32>
    %62 = arith.subf %58, %61 : vector<8x1xf32>
    %63 = math.exp %62 : vector<8x1xf32>
    %64 = vector.broadcast %61 : vector<8x1xf32> to vector<8x8xf32>
    %65 = arith.subf %56, %64 : vector<8x8xf32>
    %66 = math.exp %65 : vector<8x8xf32>
    %c1_46 = arith.constant 1 : index
    %c0_47 = arith.constant 0 : index
    %c0_48 = arith.constant 0 : index
    %67 = vector.load %arg11[%c1_46, %c0_47, %c0_48] : memref<4x8x1xf32, #tpu.memory_space<vmem>>, vector<1x8x1xf32>
    %68 = vector.shape_cast %67 : vector<1x8x1xf32> to vector<8x1xf32>
    %69 = arith.mulf %63, %68 : vector<8x1xf32>
    %cst_49 = arith.constant dense<0.000000e+00> : vector<8xf32>
    %70 = vector.multi_reduction <add>, %66, %cst_49 [1] : vector<8x8xf32> to vector<8xf32>
    %71 = vector.shape_cast %70 : vector<8xf32> to vector<8x1xf32>
    %72 = arith.addf %69, %71 : vector<8x1xf32>
    %73 = arith.truncf %66 : vector<8x8xf32> to vector<8x8xbf16>
    %cst_50 = arith.constant dense<0.000000e+00> : vector<8x8xf32>
    %74 = tpu.matmul %73, %55, %cst_50 {dimension_numbers = #tpu.dot_dimension_numbers<[1], [0], [0], [1], [0, 0, 1, 1], [], []>} : vector<8x8xbf16>, vector<8x8xbf16>, vector<8x8xf32> -> vector<8x8xf32>
    %c1_51 = arith.constant 1 : index
    %c0_52 = arith.constant 0 : index
    %c0_53 = arith.constant 0 : index
    %75 = vector.load %arg12[%c1_51, %c0_52, %c0_53] : memref<4x8x8xf32, #tpu.memory_space<vmem>>, vector<1x8x8xf32>
    %76 = vector.shape_cast %75 : vector<1x8x8xf32> to vector<8x8xf32>
    %77 = vector.broadcast %63 : vector<8x1xf32> to vector<8x8xf32>
    %78 = arith.mulf %77, %76 : vector<8x8xf32>
    %79 = arith.addf %78, %74 : vector<8x8xf32>
    %c1_54 = arith.constant 1 : index
    %c0_55 = arith.constant 0 : index
    %c0_56 = arith.constant 0 : index
    %80 = vector.load %arg12[%c1_54, %c0_55, %c0_56] : memref<4x8x8xf32, #tpu.memory_space<vmem>>, vector<1x8x8xf32>
    %81 = vector.shape_cast %80 : vector<1x8x8xf32> to vector<8x8xf32>
    %82 = vector.shape_cast %79 : vector<8x8xf32> to vector<1x8x8xf32>
    tpu.vector_store %arg12[%c1_54, %c0_55, %c0_56], %82 {strides = array<i32>} : memref<4x8x8xf32, #tpu.memory_space<vmem>>, vector<1x8x8xf32>,
    %c1_57 = arith.constant 1 : index
    %c0_58 = arith.constant 0 : index
    %c0_59 = arith.constant 0 : index
    %83 = vector.load %arg10[%c1_57, %c0_58, %c0_59] : memref<4x8x1xf32, #tpu.memory_space<vmem>>, vector<1x8x1xf32>
    %84 = vector.shape_cast %83 : vector<1x8x1xf32> to vector<8x1xf32>
    %85 = vector.shape_cast %61 : vector<8x1xf32> to vector<1x8x1xf32>
    tpu.vector_store %arg10[%c1_57, %c0_58, %c0_59], %85 {strides = array<i32>} : memref<4x8x1xf32, #tpu.memory_space<vmem>>, vector<1x8x1xf32>,
    %c1_60 = arith.constant 1 : index
    %c0_61 = arith.constant 0 : index
    %c0_62 = arith.constant 0 : index
    %86 = vector.load %arg11[%c1_60, %c0_61, %c0_62] : memref<4x8x1xf32, #tpu.memory_space<vmem>>, vector<1x8x1xf32>
    %87 = vector.shape_cast %86 : vector<1x8x1xf32> to vector<8x1xf32>
    %88 = vector.shape_cast %72 : vector<8x1xf32> to vector<1x8x1xf32>
    tpu.vector_store %arg11[%c1_60, %c0_61, %c0_62], %88 {strides = array<i32>} : memref<4x8x1xf32, #tpu.memory_space<vmem>>, vector<1x8x1xf32>,
    %89 = tpu.reciprocal %72 : vector<8x1xf32> -> vector<8x1xf32>
    %90 = vector.broadcast %89 : vector<8x1xf32> to vector<8x8xf32>
    %91 = arith.mulf %66, %90 : vector<8x8xf32>
    %cst_63 = arith.constant 2.500000e-01 : f32
    %92 = vector.broadcast %cst_63 : f32 to vector<8x8xf32>
    %93 = arith.mulf %91, %92 : vector<8x8xf32>
    %c0_64 = arith.constant 0 : index
    %c0_65 = arith.constant 0 : index
    %c0_66 = arith.constant 0 : index
    %94 = vector.load %arg9[%c0_64, %c0_65, %c0_66] : memref<1x8x8xf32, #tpu.memory_space<vmem>>, vector<1x8x8xf32>
    %95 = vector.shape_cast %94 : vector<1x8x8xf32> to vector<8x8xf32>
    %96 = arith.addf %95, %93 : vector<8x8xf32>
    %c0_67 = arith.constant 0 : index
    %c0_68 = arith.constant 0 : index
    %c0_69 = arith.constant 0 : index
    %97 = vector.load %arg9[%c0_67, %c0_68, %c0_69] : memref<1x8x8xf32, #tpu.memory_space<vmem>>, vector<1x8x8xf32>
    %98 = vector.shape_cast %97 : vector<1x8x8xf32> to vector<8x8xf32>
    %99 = vector.shape_cast %96 : vector<8x8xf32> to vector<1x8x8xf32>
    tpu.vector_store %arg9[%c0_67, %c0_68, %c0_69], %99 {strides = array<i32>} : memref<1x8x8xf32, #tpu.memory_space<vmem>>, vector<1x8x8xf32>,
    %c0_70 = arith.constant 0 : index
    %c0_71 = arith.constant 0 : index
    %c16 = arith.constant 16 : index
    %100 = vector.load %arg3[%c0_70, %c0_71, %c16] : memref<1x8x32xbf16, #tpu.memory_space<vmem>>, vector<1x8x8xbf16>
    %101 = vector.shape_cast %100 : vector<1x8x8xbf16> to vector<8x8xbf16>
    %c0_72 = arith.constant 0 : index
    %c0_73 = arith.constant 0 : index
    %c16_74 = arith.constant 16 : index
    %102 = vector.load %arg4[%c0_72, %c0_73, %c16_74] : memref<1x8x32xbf16, #tpu.memory_space<vmem>>, vector<1x8x8xbf16>
    %103 = vector.shape_cast %102 : vector<1x8x8xbf16> to vector<8x8xbf16>
    %c0_75 = arith.constant 0 : index
    %c0_76 = arith.constant 0 : index
    %c16_77 = arith.constant 16 : index
    %104 = vector.load %arg5[%c0_75, %c0_76, %c16_77] : memref<1x8x32xbf16, #tpu.memory_space<vmem>>, vector<1x8x8xbf16>
    %105 = vector.shape_cast %104 : vector<1x8x8xbf16> to vector<8x8xbf16>
    %cst_78 = arith.constant dense<0.000000e+00> : vector<8x8xf32>
    %106 = tpu.matmul %101, %103, %cst_78 {dimension_numbers = #tpu.dot_dimension_numbers<[1], [1], [0], [0], [0, 0, 1, 0], [], []>} : vector<8x8xbf16>, vector<8x8xbf16>, vector<8x8xf32> -> vector<8x8xf32>
    %c2 = arith.constant 2 : index
    %c0_79 = arith.constant 0 : index
    %c0_80 = arith.constant 0 : index
    %107 = vector.load %arg10[%c2, %c0_79, %c0_80] : memref<4x8x1xf32, #tpu.memory_space<vmem>>, vector<1x8x1xf32>
    %108 = vector.shape_cast %107 : vector<1x8x1xf32> to vector<8x1xf32>
    %cst_81 = arith.constant dense<0xFF800000> : vector<8xf32>
    %109 = vector.multi_reduction <maximumf>, %106, %cst_81 [1] : vector<8x8xf32> to vector<8xf32>
    %110 = vector.shape_cast %109 : vector<8xf32> to vector<8x1xf32>
    %111 = arith.maximumf %108, %110 : vector<8x1xf32>
    %112 = arith.subf %108, %111 : vector<8x1xf32>
    %113 = math.exp %112 : vector<8x1xf32>
    %114 = vector.broadcast %111 : vector<8x1xf32> to vector<8x8xf32>
    %115 = arith.subf %106, %114 : vector<8x8xf32>
    %116 = math.exp %115 : vector<8x8xf32>
    %c2_82 = arith.constant 2 : index
    %c0_83 = arith.constant 0 : index
    %c0_84 = arith.constant 0 : index
    %117 = vector.load %arg11[%c2_82, %c0_83, %c0_84] : memref<4x8x1xf32, #tpu.memory_space<vmem>>, vector<1x8x1xf32>
    %118 = vector.shape_cast %117 : vector<1x8x1xf32> to vector<8x1xf32>
    %119 = arith.mulf %113, %118 : vector<8x1xf32>
    %cst_85 = arith.constant dense<0.000000e+00> : vector<8xf32>
    %120 = vector.multi_reduction <add>, %116, %cst_85 [1] : vector<8x8xf32> to vector<8xf32>
    %121 = vector.shape_cast %120 : vector<8xf32> to vector<8x1xf32>
    %122 = arith.addf %119, %121 : vector<8x1xf32>
    %123 = arith.truncf %116 : vector<8x8xf32> to vector<8x8xbf16>
    %cst_86 = arith.constant dense<0.000000e+00> : vector<8x8xf32>
    %124 = tpu.matmul %123, %105, %cst_86 {dimension_numbers = #tpu.dot_dimension_numbers<[1], [0], [0], [1], [0, 0, 1, 1], [], []>} : vector<8x8xbf16>, vector<8x8xbf16>, vector<8x8xf32> -> vector<8x8xf32>
    %c2_87 = arith.constant 2 : index
    %c0_88 = arith.constant 0 : index
    %c0_89 = arith.constant 0 : index
    %125 = vector.load %arg12[%c2_87, %c0_88, %c0_89] : memref<4x8x8xf32, #tpu.memory_space<vmem>>, vector<1x8x8xf32>
    %126 = vector.shape_cast %125 : vector<1x8x8xf32> to vector<8x8xf32>
    %127 = vector.broadcast %113 : vector<8x1xf32> to vector<8x8xf32>
    %128 = arith.mulf %127, %126 : vector<8x8xf32>
    %129 = arith.addf %128, %124 : vector<8x8xf32>
    %c2_90 = arith.constant 2 : index
    %c0_91 = arith.constant 0 : index
    %c0_92 = arith.constant 0 : index
    %130 = vector.load %arg12[%c2_90, %c0_91, %c0_92] : memref<4x8x8xf32, #tpu.memory_space<vmem>>, vector<1x8x8xf32>
    %131 = vector.shape_cast %130 : vector<1x8x8xf32> to vector<8x8xf32>
    %132 = vector.shape_cast %129 : vector<8x8xf32> to vector<1x8x8xf32>
    tpu.vector_store %arg12[%c2_90, %c0_91, %c0_92], %132 {strides = array<i32>} : memref<4x8x8xf32, #tpu.memory_space<vmem>>, vector<1x8x8xf32>,
    %c2_93 = arith.constant 2 : index
    %c0_94 = arith.constant 0 : index
    %c0_95 = arith.constant 0 : index
    %133 = vector.load %arg10[%c2_93, %c0_94, %c0_95] : memref<4x8x1xf32, #tpu.memory_space<vmem>>, vector<1x8x1xf32>
    %134 = vector.shape_cast %133 : vector<1x8x1xf32> to vector<8x1xf32>
    %135 = vector.shape_cast %111 : vector<8x1xf32> to vector<1x8x1xf32>
    tpu.vector_store %arg10[%c2_93, %c0_94, %c0_95], %135 {strides = array<i32>} : memref<4x8x1xf32, #tpu.memory_space<vmem>>, vector<1x8x1xf32>,
    %c2_96 = arith.constant 2 : index
    %c0_97 = arith.constant 0 : index
    %c0_98 = arith.constant 0 : index
    %136 = vector.load %arg11[%c2_96, %c0_97, %c0_98] : memref<4x8x1xf32, #tpu.memory_space<vmem>>, vector<1x8x1xf32>
    %137 = vector.shape_cast %136 : vector<1x8x1xf32> to vector<8x1xf32>
    %138 = vector.shape_cast %122 : vector<8x1xf32> to vector<1x8x1xf32>
    tpu.vector_store %arg11[%c2_96, %c0_97, %c0_98], %138 {strides = array<i32>} : memref<4x8x1xf32, #tpu.memory_space<vmem>>, vector<1x8x1xf32>,
    %139 = tpu.reciprocal %122 : vector<8x1xf32> -> vector<8x1xf32>
    %140 = vector.broadcast %139 : vector<8x1xf32> to vector<8x8xf32>
    %141 = arith.mulf %116, %140 : vector<8x8xf32>
    %cst_99 = arith.constant 2.500000e-01 : f32
    %142 = vector.broadcast %cst_99 : f32 to vector<8x8xf32>
    %143 = arith.mulf %141, %142 : vector<8x8xf32>
    %c0_100 = arith.constant 0 : index
    %c0_101 = arith.constant 0 : index
    %c0_102 = arith.constant 0 : index
    %144 = vector.load %arg9[%c0_100, %c0_101, %c0_102] : memref<1x8x8xf32, #tpu.memory_space<vmem>>, vector<1x8x8xf32>
    %145 = vector.shape_cast %144 : vector<1x8x8xf32> to vector<8x8xf32>
    %146 = arith.addf %145, %143 : vector<8x8xf32>
    %c0_103 = arith.constant 0 : index
    %c0_104 = arith.constant 0 : index
    %c0_105 = arith.constant 0 : index
    %147 = vector.load %arg9[%c0_103, %c0_104, %c0_105] : memref<1x8x8xf32, #tpu.memory_space<vmem>>, vector<1x8x8xf32>
    %148 = vector.shape_cast %147 : vector<1x8x8xf32> to vector<8x8xf32>
    %149 = vector.shape_cast %146 : vector<8x8xf32> to vector<1x8x8xf32>
    tpu.vector_store %arg9[%c0_103, %c0_104, %c0_105], %149 {strides = array<i32>} : memref<1x8x8xf32, #tpu.memory_space<vmem>>, vector<1x8x8xf32>,
    %c0_106 = arith.constant 0 : index
    %c0_107 = arith.constant 0 : index
    %c24 = arith.constant 24 : index
    %150 = vector.load %arg3[%c0_106, %c0_107, %c24] : memref<1x8x32xbf16, #tpu.memory_space<vmem>>, vector<1x8x8xbf16>
    %151 = vector.shape_cast %150 : vector<1x8x8xbf16> to vector<8x8xbf16>
    %c0_108 = arith.constant 0 : index
    %c0_109 = arith.constant 0 : index
    %c24_110 = arith.constant 24 : index
    %152 = vector.load %arg4[%c0_108, %c0_109, %c24_110] : memref<1x8x32xbf16, #tpu.memory_space<vmem>>, vector<1x8x8xbf16>
    %153 = vector.shape_cast %152 : vector<1x8x8xbf16> to vector<8x8xbf16>
    %c0_111 = arith.constant 0 : index
    %c0_112 = arith.constant 0 : index
    %c24_113 = arith.constant 24 : index
    %154 = vector.load %arg5[%c0_111, %c0_112, %c24_113] : memref<1x8x32xbf16, #tpu.memory_space<vmem>>, vector<1x8x8xbf16>
    %155 = vector.shape_cast %154 : vector<1x8x8xbf16> to vector<8x8xbf16>
    %cst_114 = arith.constant dense<0.000000e+00> : vector<8x8xf32>
    %156 = tpu.matmul %151, %153, %cst_114 {dimension_numbers = #tpu.dot_dimension_numbers<[1], [1], [0], [0], [0, 0, 1, 0], [], []>} : vector<8x8xbf16>, vector<8x8xbf16>, vector<8x8xf32> -> vector<8x8xf32>
    %c3 = arith.constant 3 : index
    %c0_115 = arith.constant 0 : index
    %c0_116 = arith.constant 0 : index
    %157 = vector.load %arg10[%c3, %c0_115, %c0_116] : memref<4x8x1xf32, #tpu.memory_space<vmem>>, vector<1x8x1xf32>
    %158 = vector.shape_cast %157 : vector<1x8x1xf32> to vector<8x1xf32>
    %cst_117 = arith.constant dense<0xFF800000> : vector<8xf32>
    %159 = vector.multi_reduction <maximumf>, %156, %cst_117 [1] : vector<8x8xf32> to vector<8xf32>
    %160 = vector.shape_cast %159 : vector<8xf32> to vector<8x1xf32>
    %161 = arith.maximumf %158, %160 : vector<8x1xf32>
    %162 = arith.subf %158, %161 : vector<8x1xf32>
    %163 = math.exp %162 : vector<8x1xf32>
    %164 = vector.broadcast %161 : vector<8x1xf32> to vector<8x8xf32>
    %165 = arith.subf %156, %164 : vector<8x8xf32>
    %166 = math.exp %165 : vector<8x8xf32>
    %c3_118 = arith.constant 3 : index
    %c0_119 = arith.constant 0 : index
    %c0_120 = arith.constant 0 : index
    %167 = vector.load %arg11[%c3_118, %c0_119, %c0_120] : memref<4x8x1xf32, #tpu.memory_space<vmem>>, vector<1x8x1xf32>
    %168 = vector.shape_cast %167 : vector<1x8x1xf32> to vector<8x1xf32>
    %169 = arith.mulf %163, %168 : vector<8x1xf32>
    %cst_121 = arith.constant dense<0.000000e+00> : vector<8xf32>
    %170 = vector.multi_reduction <add>, %166, %cst_121 [1] : vector<8x8xf32> to vector<8xf32>
    %171 = vector.shape_cast %170 : vector<8xf32> to vector<8x1xf32>
    %172 = arith.addf %169, %171 : vector<8x1xf32>
    %173 = arith.truncf %166 : vector<8x8xf32> to vector<8x8xbf16>
    %cst_122 = arith.constant dense<0.000000e+00> : vector<8x8xf32>
    %174 = tpu.matmul %173, %155, %cst_122 {dimension_numbers = #tpu.dot_dimension_numbers<[1], [0], [0], [1], [0, 0, 1, 1], [], []>} : vector<8x8xbf16>, vector<8x8xbf16>, vector<8x8xf32> -> vector<8x8xf32>
    %c3_123 = arith.constant 3 : index
    %c0_124 = arith.constant 0 : index
    %c0_125 = arith.constant 0 : index
    %175 = vector.load %arg12[%c3_123, %c0_124, %c0_125] : memref<4x8x8xf32, #tpu.memory_space<vmem>>, vector<1x8x8xf32>
    %176 = vector.shape_cast %175 : vector<1x8x8xf32> to vector<8x8xf32>
    %177 = vector.broadcast %163 : vector<8x1xf32> to vector<8x8xf32>
    %178 = arith.mulf %177, %176 : vector<8x8xf32>
    %179 = arith.addf %178, %174 : vector<8x8xf32>
    %c3_126 = arith.constant 3 : index
    %c0_127 = arith.constant 0 : index
    %c0_128 = arith.constant 0 : index
    %180 = vector.load %arg12[%c3_126, %c0_127, %c0_128] : memref<4x8x8xf32, #tpu.memory_space<vmem>>, vector<1x8x8xf32>
    %181 = vector.shape_cast %180 : vector<1x8x8xf32> to vector<8x8xf32>
    %182 = vector.shape_cast %179 : vector<8x8xf32> to vector<1x8x8xf32>
    tpu.vector_store %arg12[%c3_126, %c0_127, %c0_128], %182 {strides = array<i32>} : memref<4x8x8xf32, #tpu.memory_space<vmem>>, vector<1x8x8xf32>,
    %c3_129 = arith.constant 3 : index
    %c0_130 = arith.constant 0 : index
    %c0_131 = arith.constant 0 : index
    %183 = vector.load %arg10[%c3_129, %c0_130, %c0_131] : memref<4x8x1xf32, #tpu.memory_space<vmem>>, vector<1x8x1xf32>
    %184 = vector.shape_cast %183 : vector<1x8x1xf32> to vector<8x1xf32>
    %185 = vector.shape_cast %161 : vector<8x1xf32> to vector<1x8x1xf32>
    tpu.vector_store %arg10[%c3_129, %c0_130, %c0_131], %185 {strides = array<i32>} : memref<4x8x1xf32, #tpu.memory_space<vmem>>, vector<1x8x1xf32>,
    %c3_132 = arith.constant 3 : index
    %c0_133 = arith.constant 0 : index
    %c0_134 = arith.constant 0 : index
    %186 = vector.load %arg11[%c3_132, %c0_133, %c0_134] : memref<4x8x1xf32, #tpu.memory_space<vmem>>, vector<1x8x1xf32>
    %187 = vector.shape_cast %186 : vector<1x8x1xf32> to vector<8x1xf32>
    %188 = vector.shape_cast %172 : vector<8x1xf32> to vector<1x8x1xf32>
    tpu.vector_store %arg11[%c3_132, %c0_133, %c0_134], %188 {strides = array<i32>} : memref<4x8x1xf32, #tpu.memory_space<vmem>>, vector<1x8x1xf32>,
    %189 = tpu.reciprocal %172 : vector<8x1xf32> -> vector<8x1xf32>
    %190 = vector.broadcast %189 : vector<8x1xf32> to vector<8x8xf32>
    %191 = arith.mulf %166, %190 : vector<8x8xf32>
    %cst_135 = arith.constant 2.500000e-01 : f32
    %192 = vector.broadcast %cst_135 : f32 to vector<8x8xf32>
    %193 = arith.mulf %191, %192 : vector<8x8xf32>
    %c0_136 = arith.constant 0 : index
    %c0_137 = arith.constant 0 : index
    %c0_138 = arith.constant 0 : index
    %194 = vector.load %arg9[%c0_136, %c0_137, %c0_138] : memref<1x8x8xf32, #tpu.memory_space<vmem>>, vector<1x8x8xf32>
    %195 = vector.shape_cast %194 : vector<1x8x8xf32> to vector<8x8xf32>
    %196 = arith.addf %195, %193 : vector<8x8xf32>
    %c0_139 = arith.constant 0 : index
    %c0_140 = arith.constant 0 : index
    %c0_141 = arith.constant 0 : index
    %197 = vector.load %arg9[%c0_139, %c0_140, %c0_141] : memref<1x8x8xf32, #tpu.memory_space<vmem>>, vector<1x8x8xf32>
    %198 = vector.shape_cast %197 : vector<1x8x8xf32> to vector<8x8xf32>
    %199 = vector.shape_cast %196 : vector<8x8xf32> to vector<1x8x8xf32>
    tpu.vector_store %arg9[%c0_139, %c0_140, %c0_141], %199 {strides = array<i32>} : memref<1x8x8xf32, #tpu.memory_space<vmem>>, vector<1x8x8xf32>,
    %c0_i32_142 = arith.constant 0 : i32
    %200 = arith.cmpi eq, %arg2, %c0_i32_142 : i32
    %201 = arith.extui %200 : i1 to i32
    %c0_i32_143 = arith.constant 0 : i32
    %202 = arith.cmpi ne, %201, %c0_i32_143 : i32
    scf.if %202 {
      %c0_144 = arith.constant 0 : index
      %c0_145 = arith.constant 0 : index
      %203 = vector.load %arg7[%c0_144, %c0_145] : memref<1x32xf32, #tpu.memory_space<vmem>>, vector<1x32xf32>
      %c0_146 = arith.constant 0 : index
      %c0_147 = arith.constant 0 : index
      %c0_148 = arith.constant 0 : index
      %204 = vector.load %arg12[%c0_146, %c0_147, %c0_148] : memref<4x8x8xf32, #tpu.memory_space<vmem>>, vector<1x8x8xf32>
      %205 = vector.shape_cast %204 : vector<1x8x8xf32> to vector<8x8xf32>
      %c0_149 = arith.constant 0 : index
      %c0_150 = arith.constant 0 : index
      %c0_151 = arith.constant 0 : index
      %206 = vector.load %arg11[%c0_149, %c0_150, %c0_151] : memref<4x8x1xf32, #tpu.memory_space<vmem>>, vector<1x8x1xf32>
      %207 = vector.shape_cast %206 : vector<1x8x1xf32> to vector<8x1xf32>
      %208 = tpu.reciprocal %207 {approx = true} : vector<8x1xf32> -> vector<8x1xf32>
      %209 = vector.broadcast %208 : vector<8x1xf32> to vector<8x8xf32>
      %210 = arith.mulf %205, %209 : vector<8x8xf32>
      %211 = arith.truncf %210 : vector<8x8xf32> to vector<8x8xbf16>
      %c0_152 = arith.constant 0 : index
      %c0_153 = arith.constant 0 : index
      %c0_154 = arith.constant 0 : index
      %212 = vector.load %arg6[%c0_152, %c0_153, %c0_154] : memref<4x8x32xbf16, #tpu.memory_space<vmem>>, vector<1x8x32xbf16>
      %213 = vector.shape_cast %212 : vector<1x8x32xbf16> to vector<8x32xbf16>
      %cst_155 = arith.constant dense<0.000000e+00> : vector<8x32xf32>
      %214 = tpu.matmul %211, %213, %cst_155 {dimension_numbers = #tpu.dot_dimension_numbers<[1], [0], [0], [1], [0, 0, 1, 1], [], []>} : vector<8x8xbf16>, vector<8x32xbf16>, vector<8x32xf32> -> vector<8x32xf32>
      %215 = vector.broadcast %203 : vector<1x32xf32> to vector<8x32xf32>
      %216 = arith.addf %215, %214 : vector<8x32xf32>
      %c1_156 = arith.constant 1 : index
      %c0_157 = arith.constant 0 : index
      %c0_158 = arith.constant 0 : index
      %217 = vector.load %arg12[%c1_156, %c0_157, %c0_158] : memref<4x8x8xf32, #tpu.memory_space<vmem>>, vector<1x8x8xf32>
      %218 = vector.shape_cast %217 : vector<1x8x8xf32> to vector<8x8xf32>
      %c1_159 = arith.constant 1 : index
      %c0_160 = arith.constant 0 : index
      %c0_161 = arith.constant 0 : index
      %219 = vector.load %arg11[%c1_159, %c0_160, %c0_161] : memref<4x8x1xf32, #tpu.memory_space<vmem>>, vector<1x8x1xf32>
      %220 = vector.shape_cast %219 : vector<1x8x1xf32> to vector<8x1xf32>
      %221 = tpu.reciprocal %220 {approx = true} : vector<8x1xf32> -> vector<8x1xf32>
      %222 = vector.broadcast %221 : vector<8x1xf32> to vector<8x8xf32>
      %223 = arith.mulf %218, %222 : vector<8x8xf32>
      %224 = arith.truncf %223 : vector<8x8xf32> to vector<8x8xbf16>
      %c1_162 = arith.constant 1 : index
      %c0_163 = arith.constant 0 : index
      %c0_164 = arith.constant 0 : index
      %225 = vector.load %arg6[%c1_162, %c0_163, %c0_164] : memref<4x8x32xbf16, #tpu.memory_space<vmem>>, vector<1x8x32xbf16>
      %226 = vector.shape_cast %225 : vector<1x8x32xbf16> to vector<8x32xbf16>
      %cst_165 = arith.constant dense<0.000000e+00> : vector<8x32xf32>
      %227 = tpu.matmul %224, %226, %cst_165 {dimension_numbers = #tpu.dot_dimension_numbers<[1], [0], [0], [1], [0, 0, 1, 1], [], []>} : vector<8x8xbf16>, vector<8x32xbf16>, vector<8x32xf32> -> vector<8x32xf32>
      %228 = arith.addf %216, %227 : vector<8x32xf32>
      %c2_166 = arith.constant 2 : index
      %c0_167 = arith.constant 0 : index
      %c0_168 = arith.constant 0 : index
      %229 = vector.load %arg12[%c2_166, %c0_167, %c0_168] : memref<4x8x8xf32, #tpu.memory_space<vmem>>, vector<1x8x8xf32>
      %230 = vector.shape_cast %229 : vector<1x8x8xf32> to vector<8x8xf32>
      %c2_169 = arith.constant 2 : index
      %c0_170 = arith.constant 0 : index
      %c0_171 = arith.constant 0 : index
      %231 = vector.load %arg11[%c2_169, %c0_170, %c0_171] : memref<4x8x1xf32, #tpu.memory_space<vmem>>, vector<1x8x1xf32>
      %232 = vector.shape_cast %231 : vector<1x8x1xf32> to vector<8x1xf32>
      %233 = tpu.reciprocal %232 {approx = true} : vector<8x1xf32> -> vector<8x1xf32>
      %234 = vector.broadcast %233 : vector<8x1xf32> to vector<8x8xf32>
      %235 = arith.mulf %230, %234 : vector<8x8xf32>
      %236 = arith.truncf %235 : vector<8x8xf32> to vector<8x8xbf16>
      %c2_172 = arith.constant 2 : index
      %c0_173 = arith.constant 0 : index
      %c0_174 = arith.constant 0 : index
      %237 = vector.load %arg6[%c2_172, %c0_173, %c0_174] : memref<4x8x32xbf16, #tpu.memory_space<vmem>>, vector<1x8x32xbf16>
      %238 = vector.shape_cast %237 : vector<1x8x32xbf16> to vector<8x32xbf16>
      %cst_175 = arith.constant dense<0.000000e+00> : vector<8x32xf32>
      %239 = tpu.matmul %236, %238, %cst_175 {dimension_numbers = #tpu.dot_dimension_numbers<[1], [0], [0], [1], [0, 0, 1, 1], [], []>} : vector<8x8xbf16>, vector<8x32xbf16>, vector<8x32xf32> -> vector<8x32xf32>
      %240 = arith.addf %228, %239 : vector<8x32xf32>
      %c3_176 = arith.constant 3 : index
      %c0_177 = arith.constant 0 : index
      %c0_178 = arith.constant 0 : index
      %241 = vector.load %arg12[%c3_176, %c0_177, %c0_178] : memref<4x8x8xf32, #tpu.memory_space<vmem>>, vector<1x8x8xf32>
      %242 = vector.shape_cast %241 : vector<1x8x8xf32> to vector<8x8xf32>
      %c3_179 = arith.constant 3 : index
      %c0_180 = arith.constant 0 : index
      %c0_181 = arith.constant 0 : index
      %243 = vector.load %arg11[%c3_179, %c0_180, %c0_181] : memref<4x8x1xf32, #tpu.memory_space<vmem>>, vector<1x8x1xf32>
      %244 = vector.shape_cast %243 : vector<1x8x1xf32> to vector<8x1xf32>
      %245 = tpu.reciprocal %244 {approx = true} : vector<8x1xf32> -> vector<8x1xf32>
      %246 = vector.broadcast %245 : vector<8x1xf32> to vector<8x8xf32>
      %247 = arith.mulf %242, %246 : vector<8x8xf32>
      %248 = arith.truncf %247 : vector<8x8xf32> to vector<8x8xbf16>
      %c3_182 = arith.constant 3 : index
      %c0_183 = arith.constant 0 : index
      %c0_184 = arith.constant 0 : index
      %249 = vector.load %arg6[%c3_182, %c0_183, %c0_184] : memref<4x8x32xbf16, #tpu.memory_space<vmem>>, vector<1x8x32xbf16>
      %250 = vector.shape_cast %249 : vector<1x8x32xbf16> to vector<8x32xbf16>
      %cst_185 = arith.constant dense<0.000000e+00> : vector<8x32xf32>
      %251 = tpu.matmul %248, %250, %cst_185 {dimension_numbers = #tpu.dot_dimension_numbers<[1], [0], [0], [1], [0, 0, 1, 1], [], []>} : vector<8x8xbf16>, vector<8x32xbf16>, vector<8x32xf32> -> vector<8x32xf32>
      %252 = arith.addf %240, %251 : vector<8x32xf32>
      %c0_186 = arith.constant 0 : index
      %c0_187 = arith.constant 0 : index
      %c0_188 = arith.constant 0 : index
      %253 = vector.load %arg8[%c0_186, %c0_187, %c0_188] : memref<1x8x32xf32, #tpu.memory_space<vmem>>, vector<1x8x32xf32>
      %254 = vector.shape_cast %253 : vector<1x8x32xf32> to vector<8x32xf32>
      %255 = vector.shape_cast %252 : vector<8x32xf32> to vector<1x8x32xf32>
      tpu.vector_store %arg8[%c0_186, %c0_187, %c0_188], %255 {strides = array<i32>} : memref<1x8x32xf32, #tpu.memory_space<vmem>>, vector<1x8x32xf32>,
    } else {
    }
    return
  }
  func.func @transform_0(%arg0: i32, %arg1: i32, %arg2: i32) -> (i32, i32, i32) {
    %c0_i32 = arith.constant 0 : i32
    %c0_i32_0 = arith.constant 0 : i32
    return %arg0, %arg1, %c0_i32 : i32, i32, i32
  }
  func.func @transform_1(%arg0: i32, %arg1: i32, %arg2: i32) -> (i32, i32, i32) {
    %c0_i32 = arith.constant 0 : i32
    %c0_i32_0 = arith.constant 0 : i32
    return %arg0, %arg2, %c0_i32 : i32, i32, i32
  }
  func.func @transform_2(%arg0: i32, %arg1: i32, %arg2: i32) -> (i32, i32, i32) {
    %c0_i32 = arith.constant 0 : i32
    %c0_i32_0 = arith.constant 0 : i32
    return %arg0, %arg2, %c0_i32 : i32, i32, i32
  }
  func.func @transform_3(%arg0: i32, %arg1: i32, %arg2: i32) -> (i32, i32, i32) {
    %c0_i32 = arith.constant 0 : i32
    %c0_i32_0 = arith.constant 0 : i32
    %c0_i32_1 = arith.constant 0 : i32
    %c0_i32_2 = arith.constant 0 : i32
    return %c0_i32, %c0_i32_0, %c0_i32_1 : i32, i32, i32
  }
  func.func @transform_4(%arg0: i32, %arg1: i32, %arg2: i32) -> (i32, i32) {
    %c0_i32 = arith.constant 0 : i32
    %c0_i32_0 = arith.constant 0 : i32
    %c0_i32_1 = arith.constant 0 : i32
    return %c0_i32, %c0_i32_0 : i32, i32
  }
  func.func @transform_5(%arg0: i32, %arg1: i32, %arg2: i32) -> (i32, i32, i32) {
    %c0_i32 = arith.constant 0 : i32
    %c0_i32_0 = arith.constant 0 : i32
    return %arg0, %arg1, %c0_i32 : i32, i32, i32
  }
  func.func @transform_6(%arg0: i32, %arg1: i32, %arg2: i32) -> (i32, i32, i32) {
    %c0_i32 = arith.constant 0 : i32
    %c0_i32_0 = arith.constant 0 : i32
    return %arg0, %arg1, %c0_i32 : i32, i32, i32
  }
}

</mosaic_0001>

<bundles_post_ra>
// kernel: self_attention_forward.2
= control target key start
LH: loop header
LB: loop body
LE: loop exit
PB: predicated region body
PF: predicated region fallthrough
CT: control target
= control target key end

     0   :  { %vm34_vm0 = vcmask 261120   ;;  %v387_v0 = vmov 0.0   ;;  %vm388_vm1 = vmmov 0   ;;  %vm263_vm2 = vcmask 257024   ;;  %s511_s1 = inlined_call_operand.vmem [shape: bf16[32,32], index: 1, kind: input, shape index: {}]   ;;  %s512_s2 = inlined_call_operand.vmem [shape: bf16[32,32], index: 2, kind: input, shape index: {}]   ;;  %s513_s0 = inlined_call_operand.vmem [shape: bf16[16,32], index: 0, kind: input, shape index: {}]   ;;  %s514_s3 = inlined_call_operand.vmem [shape: bf16[32,32], index: 3, kind: input, shape index: {}]   ;;  %s515_s4 = inlined_call_operand.vmem [shape: f32[1,32], index: 4, kind: input, shape index: {}]   ;;  %s516_s5 = inlined_call_operand.vmem [shape: f32[1,32], index: 5, kind: input, shape index: {}]   ;;  %s517_s7 = inlined_call_operand.vmem [shape: bf16[16,32], index: 7, kind: output, shape index: {0}]   ;;  %s518_s6 = inlined_call_operand.vmem [shape: f32[1,32], index: 6, kind: input, shape index: {}]   ;;  %s519_s8 = inlined_call_operand.vmem [shape: bf16[16,32], index: 8, kind: output, shape index: {1}]   ;;  %s520_s9 = inlined_call_operand.vmem [shape: bf16[16,32], index: 9, kind: output, shape index: {2}]  }
   0x1   :  { %354 = vmatprep.subr.bf16.mxu0 %v387_v0  ;;  %v380_v1 = vld [vmem:[%s511_s1] sm:$0xff]   ;;  %362 = vmatprep.subr.bf16.mxu1 %v387_v0  ;;  %35 = vst.msk [vmem:[#allocation2] sm:$0xff] %vm34_vm0, %v387_v0  ;;  %36 = vst.msk [vmem:[#allocation2 + $0x8] sm:$0xff] %vm34_vm0, %v387_v0  ;;  %v381_v2 = vld [vmem:[%s511_s1 + $0x8] sm:$0xff]  }
   0x2   :  { %37 = vst.msk [vmem:[#allocation3] sm:$0xff] %vm34_vm0, %v387_v0  ;;  %38 = vst.msk [vmem:[#allocation3 + $0x8] sm:$0xff] %vm34_vm0, %v387_v0  ;;  %358 = vmatprep.mubr.msk.bf16.mxu0 %vm388_vm1, %v387_v0  ;;  %366 = vmatprep.mubr.msk.bf16.mxu1 %vm388_vm1, %v387_v0  ;;  %v382_v3 = vld [vmem:[%s512_s2] sm:$0xff]   ;;  %v385_v5 = vld [vmem:[%s512_s2 + $0x8] sm:$0xff]  }
   0x3   :  { %39 = vst.msk [vmem:[#allocation4] sm:$0xff] %vm34_vm0, %v387_v0  ;;  %40 = vst.msk [vmem:[#allocation4 + $0x8] sm:$0xff] %vm34_vm0, %v387_v0  ;;  %355 = vmatpush3.bf16.msra.mxu0 %v380_v1  ;;  %363 = vmatpush3.bf16.msra.mxu1 %v382_v3  ;;  %v383_v4 = vld [vmem:[%s513_s0] sm:$0xff]   ;;  %v386_v7 = vld [vmem:[%s514_s3 + $0x8] sm:$0xff]  }
   0x4   :  { %356 = vmatprep.subr.bf16.mxu0 %v387_v0  ;;  %364 = vmatprep.subr.bf16.mxu1 %v387_v0  ;;  %v384_v6 = vld [vmem:[%s514_s3] sm:$0xff]  }
   0x5   :  { %v330_v25 = vld [vmem:[%s515_s4] ss:$0 sm:$0xff] }
   0x6   :  { %v333_v31 = vld [vmem:[%s516_s5] ss:$0 sm:$0xff] }
   0x7   :  { %357 = vmatpush3.bf16.msra.mxu0 %v381_v2  ;;  %365 = vmatpush3.bf16.msra.mxu1 %v385_v5  ;;  %v336_v45 = vld [vmem:[%s518_s6] ss:$0 sm:$0xff] }
   0x8   :  { %370 = vmatprep.subr.bf16.mxu0 %v387_v0  ;;  %v43_v8 = vld [vmem:[#allocation2] sm:$0xff]  ;;  %v44_v10 = vld [vmem:[#allocation2 + $0x8] sm:$0xff] }
   0x9   :  { %v115_v11 = vld [vmem:[#allocation3] sm:$0xff]  ;;  %v116_v16 = vld [vmem:[#allocation3 + $0x8] sm:$0xff] }
   0xa   :  { %359 = vmatmul.mubr.msk.bf16.vlgmr.msra.gmra.mrb[0].mxu0 %vm34_vm0, %v383_v4  ;;  %367 = vmatmul.mubr.msk.bf16.vlgmr.msra.gmra.mrb[0].mxu1 %vm34_vm0, %v383_v4  ;;  %v178_v24 = vld [vmem:[#allocation4] sm:$0xff]  ;;  %v179_v27 = vld [vmem:[#allocation4 + $0x8] sm:$0xff] }
   0xb   :  { %371 = vmatpush3.bf16.msra.mxu0 %v384_v6  ;;  %374 = vmatprep.mubr.msk.bf16.mxu0 %vm388_vm1, %v387_v0 }
   0xc   :  { %372 = vmatprep.subr.bf16.mxu0 %v387_v0 }
   0xf   :  { %373 = vmatpush3.bf16.msra.mxu0 %v386_v7 }
  0x12   :  { %375 = vmatmul.mubr.msk.bf16.vlgmr.msra.gmra.mrb[4].mxu0 %vm34_vm0, %v383_v4 }
  0xdd   :  { %v104_v9 = vpop.f32.mrb[0].mxu0  ;;  %v167_v15 = vpop.f32.mrb[0].mxu1 }
  0xde   :  { %v111_v12 = vadd.f32 %v104_v9, %v43_v8  ;;  %v360_v13 = vpop.f32.mrb[1].mxu0  ;;  %v174_v19 = vadd.f32 %v167_v15, %v115_v11  ;;  %v368_v20 = vpop.f32.mrb[1].mxu1 }
  0xdf   :  { %v107_v14 = vpop.f32.mrb[2].mxu0  ;;  %v170_v21 = vpop.f32.mrb[2].mxu1 }
  0xe0   :  { %113 = vst.msk [vmem:[#allocation2] sm:$0xff] %vm34_vm0, %v111_v12  ;;  %v112_v17 = vadd.f32 %v107_v14, %v44_v10  ;;  %v361_v18 = vpop.f32.mrb[3].mxu0  ;;  %176 = vst.msk [vmem:[#allocation3] sm:$0xff] %vm34_vm0, %v174_v19  ;;  %v175_v22 = vadd.f32 %v170_v21, %v116_v16  ;;  %v369_v23 = vpop.f32.mrb[3].mxu1 }
  0xe2   :  { %114 = vst.msk [vmem:[#allocation2 + $0x8] sm:$0xff] %vm34_vm0, %v112_v17  ;;  %177 = vst.msk [vmem:[#allocation3 + $0x8] sm:$0xff] %vm34_vm0, %v175_v22 }
  0xe5   :  { %v230_v26 = vpop.f32.mrb[4].mxu0 }
  0xe6   :  { %v237_v28 = vadd.f32 %v230_v26, %v178_v24  ;;  %v376_v29 = vpop.f32.mrb[5].mxu0 }
  0xe7   :  { %v244_v30 = vld [vmem:[#allocation2] sm:$0xff]  ;;  %v233_v32 = vpop.f32.mrb[6].mxu0  ;;  %v266_v37 = vld [vmem:[#allocation3] sm:$0xff] }
  0xe8   :  { %v253_v33 = vadd.f32 %v330_v25, %v244_v30  ;;  %239 = vst.msk [vmem:[#allocation4] sm:$0xff] %vm34_vm0, %v237_v28  ;;  %v238_v34 = vadd.f32 %v233_v32, %v179_v27  ;;  %v377_v35 = vpop.f32.mrb[7].mxu0  ;;  %v275_v40 = vadd.f32 %v333_v31, %v266_v37 }
  0xe9   :  { %v245_v36 = vld [vmem:[#allocation2 + $0x8] sm:$0xff]  ;;  %v267_v41 = vld [vmem:[#allocation3 + $0x8] sm:$0xff] }
  0xea   :  { %v339_v38 = vpack.c.bf16 %v253_v33, %v253_v33  ;;  %v254_v39 = vadd.f32 %v330_v25, %v245_v36  ;;  %240 = vst.msk [vmem:[#allocation4 + $0x8] sm:$0xff] %vm34_vm0, %v238_v34  ;;  %v341_v43 = vpack.c.bf16 %v275_v40, %v275_v40  ;;  %v276_v44 = vadd.f32 %v333_v31, %v267_v41 }
  0xec   :  { %264 = vst.msk [vmem:[%s517_s7] sm:$0xf] %vm263_vm2, %v339_v38  ;;  %v340_v42 = vpack.c.bf16 %v254_v39, %v254_v39  ;;  %285 = vst.msk [vmem:[%s519_s8] sm:$0xf] %vm263_vm2, %v341_v43  ;;  %v342_v46 = vpack.c.bf16 %v276_v44, %v276_v44 }
  0xee   :  { %265 = vst.msk [vmem:[%s517_s7 + $0x4] sm:$0xf] %vm263_vm2, %v340_v42  ;;  %286 = vst.msk [vmem:[%s519_s8 + $0x4] sm:$0xf] %vm263_vm2, %v342_v46 }
  0xef   :  { %v287_v47 = vld [vmem:[#allocation4] sm:$0xff] }
  0xf0   :  { %v296_v48 = vadd.f32 %v336_v45, %v287_v47 }
  0xf1   :  { %v288_v49 = vld [vmem:[#allocation4 + $0x8] sm:$0xff] }
  0xf2   :  { %v343_v50 = vpack.c.bf16 %v296_v48, %v296_v48  ;;  %v297_v51 = vadd.f32 %v336_v45, %v288_v49 }
  0xf4   :  { %306 = vst.msk [vmem:[%s520_s9] sm:$0xf] %vm263_vm2, %v343_v50  ;;  %v344_v52 = vpack.c.bf16 %v297_v51, %v297_v51 }
  0xf6   :  { %307 = vst.msk [vmem:[%s520_s9 + $0x4] sm:$0xf] %vm263_vm2, %v344_v52 }

// kernel: self_attention_forward.3
= control target key start
LH: loop header
LB: loop body
LE: loop exit
PB: predicated region body
PF: predicated region fallthrough
CT: control target
= control target key end

     0   :  { %12 = vsyncpa [#allocation6], 0  ;;  %s2114_s0 = inlined_call_operand.vmem [shape: bf16[2,8,32], index: 0, kind: input, shape index: {}]   ;;  %s2115_s1 = inlined_call_operand.vmem [shape: bf16[2,8,32], index: 1, kind: input, shape index: {}]   ;;  %s2116_s2 = inlined_call_operand.vmem [shape: bf16[2,8,32], index: 2, kind: input, shape index: {}]   ;;  %s2117_s3 = inlined_call_operand.vmem [shape: bf16[4,8,32], index: 3, kind: input, shape index: {}]   ;;  %s2118_s4 = inlined_call_operand.vmem [shape: f32[1,32], index: 4, kind: input, shape index: {}]   ;;  %s2119_s5 = inlined_call_operand.vmem [shape: f32[2,8,32], index: 5, kind: output, shape index: {0}]   ;;  %s2120_s6 = inlined_call_operand.hbm [shape: f32[2,8,8], index: 6, kind: output, shape index: {1}]  }
   0x1   :  { %14 = vsyncpa [#allocation6 + $0x1], 0  ;;  %s1771_s21 = smov 0   ;;  %s1773_s22 = smov 0  }
   0x2   :  { %s1775_s23 = smov 0   ;;  %s1777_s24 = smov 0  }
   0x3   :  { %s1779_s25 = smov 0   ;;  %s1781_s26 = smov 0  }
   0x4 LB: > { %s1395_s27 = sadd.s32 4294967295, %s1726_s26   ;;  %s1396_s28 = sadd.s32 4294967294, %s1726_s26   ;;  %s1726_s26 = sphi %s1781_s26, %s20_s26   ;;  %s1722_s25 = sphi %s1779_s25, %s2127_s25   ;;  %s1718_s24 = sphi %s1777_s24, %s2126_s24   ;;  %s1714_s23 = sphi %s1775_s23, %s2125_s23   ;;  %s1710_s22 = sphi %s1773_s22, %s2124_s22   ;;  %s1706_s21 = sphi %s1771_s21, %s2123_s21  }
   0x5   : > { %s39_s29 = sadd.s32 1, %s1722_s25  ;;  %s202_s30 = sadd.s32 1, %s1714_s23 }
   0x6   : > { %p41_p0 = scmp.ge.s32.totalorder %s39_s29, 2  ;;  %p212_p1 = scmp.ne.s32.totalorder %s1714_s23, %s1710_s22 }
   0x7   : > { %p213_p2 = scmp.eq.s32.totalorder %s1395_s27, 1  ;;  %p218_p3 = scmp.ne.s32.totalorder %s1710_s22, %s1706_s21 }
   0x8   : > { %s2129_s29 = smov (%p41_p0, %s39_s29), 0  ;;  %p219_p5 = scmp.eq.s32.totalorder %s1396_s28, 1 }
   0x9   : > { %p1811_p4 = por %p213_p2, %p212_p1  ;;  %s197_s8 = ssub.s32 %s1722_s25, %s2129_s29 }
   0xa   : > { %p1399_p6 = scmp.ge.s32.totalorder %s1726_s26, 1  ;;  %p200_p7 = scmp.eq.s32.totalorder %s197_s8, 0 }
   0xb   : > { %p1818_p8 = por %p219_p5, %p218_p3  ;;  %p273_p9 = scmp.lt.s32.totalorder %s1726_s26, 3 }
   0xc   : > { %s1824_s10 = scalar_select %p200_p7, %s1714_s23, %s202_s30  }
   0xd   : > { %p274_p10 = pnand %p1399_p6, %p273_p9 }
   0xe   : > { %p326_p11 = scmp.lt.s32.totalorder (!%p274_p10), %s1718_s24, 1  ;;  %vm368_vm0 = vcmask (!%p274_p10), 64512   ;;  %v1728_v0 = vmov (!%p274_p10), 0.0   ;;  %vm1729_vm1 = vmmov (!%p274_p10), 0   ;;  %s1730_s19 = smov (!%p274_p10), 120   ;;  %vm359_vm2 = vcmask (!%p274_p10), 7168  }
   0xf   : > { %277 = sbr.rel (%p274_p10) target bundleno = 1580 (0x62c), region = 40  ;;  %1458 = vmatprep.subr.bf16.mxu0 (!%p274_p10), %v1728_v0  ;;  %369 = vst.msk [vmem:[#allocation4] sm:$0xff] (!%p274_p10), %vm368_vm0, %v1728_v0  ;;  %370 = vst.msk [vmem:[#allocation4 + $0x8] sm:$0xff] (!%p274_p10), %vm368_vm0, %v1728_v0  ;;  %1460 = vmatprep.mubr.msk.bf16.mxu0 (!%p274_p10), %vm1729_vm1, %v1728_v0  ;;  %s1731_s20 = smov (!%p274_p10), 112   ;;  %v1732_v8 = vmov (!%p274_p10), -1e+30  }
  0x10   : > { %371 = vst.msk [vmem:[#allocation4 + $0x10] sm:$0xff] (!%p274_p10), %vm368_vm0, %v1728_v0  ;;  %372 = vst.msk [vmem:[#allocation4 + $0x18] sm:$0xff] (!%p274_p10), %vm368_vm0, %v1728_v0  ;;  %1482 = vmatprep.subr.bf16.mxu1 (!%p274_p10), %v1728_v0  ;;  %1484 = vmatprep.mubr.msk.bf16.mxu1 (!%p274_p10), %vm1729_vm1, %v1728_v0  ;;  %v1733_v19 = vmov (!%p274_p10), 0   ;;  %s1734_s27 = smov (!%p274_p10), 104   ;;  %vm449_vm3 = vcmask (!%p274_p10), 1043456   ;;  %s1431_s30 = sshll.u32 (!%p274_p10), %s1718_s24, 7 }
  0x11   : > { %360 = vst.msk [vmem:[#allocation2] sm:$0xff] (!%p274_p10), %vm359_vm2, %v1732_v8  ;;  %361 = vst.msk [vmem:[#allocation2 + $0x8] sm:$0xff] (!%p274_p10), %vm359_vm2, %v1732_v8  ;;  %1605 = vset.pattern.permute.xlu0 (!%p274_p10), %v1733_v19  ;;  %1606 = vset.pattern.permute.xlu1 (!%p274_p10), %v1733_v19  ;;  %s2064_s14 = scalar_lea.hbm (!%p274_p10), %s2120_s6, %s1431_s30  ;;  %s1735_s17 = smov (!%p274_p10), [#allocation5]  }
  0x12   : > { %362 = vst.msk [vmem:[#allocation2 + $0x10] sm:$0xff] (!%p274_p10), %vm359_vm2, %v1732_v8  ;;  %363 = vst.msk [vmem:[#allocation2 + $0x18] sm:$0xff] (!%p274_p10), %vm359_vm2, %v1732_v8 }
  0x13   : > { %364 = vst.msk [vmem:[#allocation3] sm:$0xff] (!%p274_p10), %vm359_vm2, %v1728_v0  ;;  %365 = vst.msk [vmem:[#allocation3 + $0x8] sm:$0xff] (!%p274_p10), %vm359_vm2, %v1728_v0 }
  0x14   : > { %366 = vst.msk [vmem:[#allocation3 + $0x10] sm:$0xff] (!%p274_p10), %vm359_vm2, %v1728_v0  ;;  %367 = vst.msk [vmem:[#allocation3 + $0x18] sm:$0xff] (!%p274_p10), %vm359_vm2, %v1728_v0 }
  0x16   : > { %s1839_s11 = scalar_select %p326_p11, %s1718_s24, 1 }
  0x18   : > { %s1845_s12 = sshll.u32 %s1839_s11, 2  ;;  %v1898_v26 = vld [vmem:[#allocation2] sm:$0xff]  ;;  %v574_v60 = vld [vmem:[#allocation2 + $0x8] sm:$0xff] }
  0x19   : > { %s1851_s15 = scalar_lea.vmem %s2115_s1, %s1845_s12  ;;  %s1858_s18 = scalar_lea.vmem %s2114_s0, %s1845_s12  ;;  %v1936_v42 = vld [vmem:[#allocation2 + $0x10] sm:$0xff]  ;;  %v1950_v63 = vld [vmem:[#allocation2 + $0x18] sm:$0xff] }
  0x1a   : > { %v374_v1 = vld [vmem:[%s1851_s15] sm:$0xf]  ;;  %s1912_s8 = scalar_lea.vmem %s2116_s2, %s1845_s12 }
  0x1b   : > { %v381_v2 = vsel %vm368_vm0, %v374_v1, 0  ;;  %v1607_v3 = vld [vmem:[%s1851_s15] ss:$0 sps:$4 sm:$0xff]  }
  0x1c   : > { %1459 = vmatpush3.bf16.xpose.msra.mxu0 %v381_v2  ;;  %525 = vrot.lane.b32.xlu1 %v1607_v3, %s1730_s19  ;;  %v1608_v4 = vld [vmem:[%s1858_s18] ss:$0 sps:$4 sm:$0xff]  }
  0x1d   : > { %1464 = vmatprep.subr.bf16.mxu0 %v1728_v0  ;;  %v373_v5 = vld [vmem:[%s1858_s18] sm:$0xf] }
  0x1e   : > { %v1609_v6 = vld [vmem:[%s1851_s15] ss:$0 sps:$4 sm:$0xff]  }
  0x1f   : > { %v1610_v7 = vld [vmem:[%s1858_s18] ss:$0 sps:$4 sm:$0xff]  }
  0x20   : > { %520 = vrot.lane.b32.xlu1 %v1608_v4, %s1730_s19  ;;  %v1611_v20 = vld [vmem:[%s1851_s15] ss:$0 sps:$4 sm:$0xff]  }
  0x21   : > { %v1612_v21 = vld [vmem:[%s1858_s18] ss:$0 sps:$4 sm:$0xff]   ;;  %s323_s18 = sand.u32 1, %s1710_s22  }
  0x22   : > { %v375_v30 = vld [vmem:[%s1912_s8] sm:$0xf]  ;;  %s1243_s15 = scalar_lea.sflag [#allocation6], %s323_s18 }
  0x23   : > { %1461 = vmatmul.mubr.msk.bf16.vlgmr.msra.gmra.mrb[0].mxu0 %vm368_vm0, %v373_v5  ;;  %v451_v31 = vsel %vm449_vm3, %v375_v30, 0  ;;  %v1613_v2 = vld [vmem:[%s1912_s8] ss:$0 sps:$4 sm:$0xff]  }
  0x24   : > { %1466 = vmatprep.mubr.msk.bf16.mxu0 %vm1729_vm1, %v1728_v0  ;;  %683 = vrot.lane.b32.xlu1 %v1609_v6, %s1731_s20  ;;  %v1614_v6 = vld [vmem:[%s1912_s8] ss:$0 sps:$4 sm:$0xff]  }
  0x25   : > { %1465 = vmatpush3.bf16.msra.mxu0 %v451_v31 }
  0x26   : > { %1470 = vmatprep.subr.bf16.mxu0 %v1728_v0 }
  0x28   : > { %678 = vrot.lane.b32.xlu1 %v1610_v7, %s1731_s20  ;;  %v1615_v7 = vld [vmem:[%s1912_s8] ss:$0 sps:$4 sm:$0xff]  }
  0x2c   : > { %841 = vrot.lane.b32.xlu1 %v1611_v20, %s1734_s27 }
  0x30   : > { %836 = vrot.lane.b32.xlu1 %v1612_v21, %s1734_s27 }
  0x8e   : > { %v526_v9 = vpop.permute.xlu1 %525 }
  0x8f   : > { %v531_v40 = vsel %vm368_vm0, %v526_v9, 0 }
  0x92   : > { %v521_v10 = vpop.permute.xlu1 %520 }
  0x96   : > { %v684_v11 = vpop.permute.xlu1 %683 }
  0x97   : > { %v689_v12 = vsel %vm368_vm0, %v684_v11, 0 }
  0x98   : > { %1483 = vmatpush3.bf16.xpose.msra.mxu1 %v689_v12 }
  0x99   : > { %1494 = vmatprep.subr.bf16.mxu1 %v1728_v0 }
  0x9a   : > { %v679_v13 = vpop.permute.xlu1 %678 }
  0x9e   : > { %v842_v32 = vpop.permute.xlu1 %841 }
  0x9f   : > { %1485 = vmatmul.mubr.msk.bf16.vlgmr.msra.gmra.mrb[0].mxu1 %vm368_vm0, %v679_v13  ;;  %v847_v33 = vsel %vm368_vm0, %v842_v32, 0 }
  0xa0   : > { %1496 = vmatprep.mubr.msk.bf16.mxu1 %vm1729_vm1, %v1728_v0  ;;  %1495 = vmatpush3.bf16.xpose.msra.mxu1 %v847_v33 }
  0xa1   : > { %1506 = vmatprep.subr.bf16.mxu1 %v1728_v0 }
  0xa2   : > { %v837_v34 = vpop.permute.xlu1 %836 }
  0xa7   : > { %1497 = vmatmul.mubr.msk.bf16.vlgmr.msra.gmra.mrb[4].mxu1 %vm368_vm0, %v837_v34 }
  0xa8   : > { %1508 = vmatprep.mubr.msk.bf16.mxu1 %vm1729_vm1, %v1728_v0 }
  0xf6   : > { %v417_v14 = vpop.f32.mrb[0].mxu0 }
  0xf7   : > { %v1462_v15 = vpop.f32.mrb[1].mxu0  ;;  %v424_v16 = vsel %vm368_vm0, %v417_v14, -inf }
  0xf8   : > { %425 = vmax.xlane.f32.xlu0 %v424_v16  ;;  %v420_v17 = vpop.f32.mrb[2].mxu0 }
  0xf9   : > { %v1463_v18 = vpop.f32.mrb[3].mxu0 }
 0x172   : > { %v1896_v22 = vpop.f32.mrb[0].mxu1 }
 0x173   : > { %v1486_v23 = vpop.f32.mrb[1].mxu1  ;;  %v733_v35 = vsel %vm368_vm0, %v1896_v22, -inf }
 0x174   : > { %v728_v24 = vpop.f32.mrb[2].mxu1 }
 0x175   : > { %v1487_v25 = vpop.f32.mrb[3].mxu1 }
 0x17a   : > { %v883_v46 = vpop.f32.mrb[4].mxu1 }
 0x17b   : > { %v1498_v47 = vpop.f32.mrb[5].mxu1  ;;  %v891_v59 = vsel %vm368_vm0, %v883_v46, -inf }
 0x17c   : > { %v886_v48 = vpop.f32.mrb[6].mxu1 }
 0x17d   : > { %v1499_v49 = vpop.f32.mrb[7].mxu1  ;;  %v1002_v48 = vld [vmem:[%s2117_s3] sm:$0xf] }
 0x17e   : > { %v1007_v49 = vsel %vm449_vm3, %v1002_v48, 0 }
 0x17f   : > { %1507 = vmatpush3.bf16.msra.mxu1 %v1007_v49  ;;  %v1426_v49 = vld [vmem:[%s2117_s3 + $0x8] sm:$0xf] }
 0x180   : > { %1512 = vmatprep.subr.bf16.mxu1 %v1728_v0 }
 0x185   : > { %v426_v27 = vpop.xlane.xlu0 %425 }
 0x186   : > { %v1901_v28 = vmax.f32 %v1898_v26, %v426_v27 }
 0x188   : > { %v428_v29 = vsub.f32 %v1898_v26, %v1901_v28  ;;  %503 = vst.msk [vmem:[#allocation2] sm:$0xff] %vm359_vm2, %v1901_v28  ;;  %433 = vperm.xlu0 %1605, %v1901_v28  }
 0x1a7   : > { %734 = vmax.xlane.f32.xlu0 %v733_v35 }
 0x207   : > { %v434_v36 = vpop.permute.xlu0 %433 }
 0x208   : > { %v436_v37 = vsub.f32 %v417_v14, %v434_v36  ;;  %v429_v36 = vmul.f32 1.442695, %v428_v29  ;;  %v439_v29 = vld [vmem:[#allocation3] sm:$0xff] }
 0x20a   : > { %v437_v38 = vmul.f32 1.442695, %v436_v37 }
 0x20c   : > { %1616 = vpow2.f32 %v437_v38 }
 0x216   : > { %v1924_v39 = vpop.eup %1616 }
 0x217   : > { %v445_v41 = vpack.c.bf16 %v1924_v39, %v1924_v39  ;;  %v441_v8 = vsel %vm368_vm0, %v1924_v39, 0.0 }
 0x219   : > { %1467 = vmatmul.mubr.msk.bf16.vlgmr.msra.gmra.mrb[4].mxu0 %vm368_vm0, %v445_v41 }
 0x21a   : > { %1471 = vmatpush3.bf16.xpose.msra.mxu0 %v531_v40  ;;  %1472 = vmatprep.mubr.msk.bf16.mxu0 %vm1729_vm1, %v1728_v0 }
 0x21b   : > { %1476 = vmatprep.subr.bf16.mxu0 %v1728_v0 }
 0x221   : > { %1473 = vmatmul.mubr.msk.bf16.vlgmr.msra.gmra.mrb[8].mxu0 %vm368_vm0, %v521_v10 }
 0x222   : > { %1478 = vmatprep.mubr.msk.bf16.mxu0 %vm1729_vm1, %v1728_v0 }
 0x234   : > { %v735_v43 = vpop.xlane.xlu0 %734 }
 0x235   : > { %v1939_v44 = vmax.f32 %v1936_v42, %v735_v43 }
 0x237   : > { %v737_v45 = vsub.f32 %v1936_v42, %v1939_v44  ;;  %817 = vst.msk [vmem:[#allocation2 + $0x10] sm:$0xff] %vm359_vm2, %v1939_v44  ;;  %742 = vperm.xlu0 %1605, %v1939_v44  }
 0x239   : > { %v738_v37 = vmul.f32 1.442695, %v737_v45 }
 0x2b6   : > { %v743_v9 = vpop.permute.xlu0 %742 }
 0x2b7   : > { %v745_v10 = vsub.f32 %v1896_v22, %v743_v9 }
 0x2b9   : > { %v746_v13 = vmul.f32 1.442695, %v745_v10 }
 0x2ec   : > { %v1946_v50 = vpop.f32.mrb[4].mxu0 }
 0x2ed   : > { %v1468_v51 = vpop.f32.mrb[5].mxu0 }
 0x2ee   : > { %v490_v52 = vpop.f32.mrb[6].mxu0  ;;  %v591_v51 = vld [vmem:[#allocation3 + $0x8] sm:$0xff] }
 0x2ef   : > { %v1469_v53 = vpop.f32.mrb[7].mxu0 }
 0x2f4   : > { %v567_v54 = vpop.f32.mrb[8].mxu0 }
 0x2f5   : > { %v1474_v55 = vpop.f32.mrb[9].mxu0  ;;  %v575_v56 = vsel %vm368_vm0, %v567_v54, -inf }
 0x2f6   : > { %576 = vmax.xlane.f32.xlu1 %v575_v56  ;;  %v570_v57 = vpop.f32.mrb[10].mxu0 }
 0x2f7   : > { %v1475_v58 = vpop.f32.mrb[11].mxu0 }
 0x2f8   : > { %v907_v58 = vld [vmem:[#allocation3 + $0x18] sm:$0xff] }
 0x2fa   : > { %892 = vmax.xlane.f32.xlu1 %v891_v59 }
 0x383   : > { %v577_v61 = vpop.xlane.xlu1 %576 }
 0x384   : > { %v578_v62 = vmax.f32 %v574_v60, %v577_v61 }
 0x386   : > { %v579_v1 = vsub.f32 %v574_v60, %v578_v62  ;;  %659 = vst.msk [vmem:[#allocation2 + $0x8] sm:$0xff] %vm359_vm2, %v578_v62  ;;  %584 = vperm.xlu1 %1606, %v578_v62  }
 0x387   : > { %v893_v3 = vpop.xlane.xlu1 %892 }
 0x388   : > { %v894_v4 = vmax.f32 %v1950_v63, %v893_v3  ;;  %v580_v35 = vmul.f32 1.442695, %v579_v1 }
 0x38a   : > { %601 = vrot.lane.b32.xlu1 %v1613_v2, %s1730_s19  ;;  %v895_v5 = vsub.f32 %v1950_v63, %v894_v4  ;;  %975 = vst.msk [vmem:[#allocation2 + $0x18] sm:$0xff] %vm359_vm2, %v894_v4  ;;  %v493_v63 = vld [vmem:[#allocation4] sm:$0xff]  ;;  %s1400_s19 = sshll.u32 %s323_s18, 3 }
 0x38b   : > { %s2038_s28 = scalar_lea.vmem [#allocation5], %s1400_s19  ;;  %s1652_s19 = sshll.u32 %s1735_s17, 4  ;;  %s1653_s19 = int_to_ptr.vmem [resolvable:$false] %s1652_s19 }
 0x38c   : > { %v896_v40 = vmul.f32 1.442695, %v895_v5  ;;  %s1260_s8 = sshll.u32 %s2038_s28, 4  ;;  %s1261_s8 = int_to_ptr.vmem [resolvable:$true] %s1260_s8 }
 0x38d   : > { %s1648_s16 = scalar_lea.vmem %s1261_s8, 128  ;;  %p1655_p1 = scmp.lt.s32.totalorder %s1261_s8, %s1653_s19 }
 0x38e   : > { %900 = vperm.xlu1 %1606, %v894_v4   ;;  %p1649_p12 = scmp.ne.s32.totalorder %s1261_s8, %s1648_s16 }
 0x390   : > { %p1650_p13 = pnand %p1649_p12, %p1811_p4 }
 0x392   : > { %759 = vrot.lane.b32.xlu1 %v1614_v6, %s1731_s20  ;;  %p1651_p0 = pneg %p1650_p13  ;;  %s1654_s20 = scalar_lea.vmem %s1653_s19, 256 }
 0x393   : > { %p1656_p2 = scmp.lt.s32.totalorder %s1654_s20, %s1648_s16 }
 0x395   : > { %p1657_p3 = por %p1656_p2, %p1655_p1 }
 0x396   : > { %917 = vrot.lane.b32.xlu1 %v1615_v7, %s1734_s27 }
 0x397   : > { %p1658_p5 = pnand %p1657_p3, %p1651_p0 }
 0x3ba   : > { %442 = vadd.xlane.f32.xlu1 %v441_v8 }
 0x405   : > { %v585_v11 = vpop.permute.xlu1 %584 }
 0x406   : > { %v587_v12 = vsub.f32 %v567_v54, %v585_v11  ;;  %v749_v54 = vld [vmem:[#allocation3 + $0x10] sm:$0xff] }
 0x408   : > { %v588_v14 = vmul.f32 1.442695, %v587_v12 }
 0x409   : > { %v602_v15 = vpop.permute.xlu1 %601 }
 0x40a   : > { %1618 = vpow2.f32 %v588_v14  ;;  %v607_v16 = vsel %vm449_vm3, %v602_v15, 0 }
 0x40b   : > { %1477 = vmatpush3.bf16.msra.mxu0 %v607_v16  ;;  %1620 = vpow2.f32 %v746_v13  ;;  %v1424_v16 = vld [vmem:[%s2117_s3 + $0x4] sm:$0xf] }
 0x40c   : > { %1488 = vmatprep.subr.bf16.mxu0 %v1728_v0 }
 0x40d   : > { %v901_v17 = vpop.permute.xlu1 %900 }
 0x40e   : > { %v903_v18 = vsub.f32 %v883_v46, %v901_v17 }
 0x410   : > { %v904_v19 = vmul.f32 1.442695, %v903_v18 }
 0x411   : > { %v760_v20 = vpop.permute.xlu1 %759 }
 0x412   : > { %1622 = vpow2.f32 %v904_v19  ;;  %v765_v24 = vsel %vm449_vm3, %v760_v20, 0  ;;  %v1072_v19 = vsel %vm449_vm3, %v1424_v16, 0  ;;  %v650_v20 = vld [vmem:[#allocation4 + $0x8] sm:$0xff] }
 0x413   : > { %1624 = vpow2.f32 %v580_v35 }
 0x414   : > { %v1967_v21 = vpop.eup %1618  ;;  %1626 = vpow2.f32 %v429_v36 }
 0x415   : > { %v593_v22 = vsel %vm368_vm0, %v1967_v21, 0.0  ;;  %v597_v23 = vpack.c.bf16 %v1967_v21, %v1967_v21  ;;  %v1974_v25 = vpop.eup %1620  ;;  %v918_v30 = vpop.permute.xlu1 %917  ;;  %1628 = vpow2.f32 %v738_v37 }
 0x416   : > { %594 = vadd.xlane.f32.xlu0 %v593_v22  ;;  %v751_v27 = vsel %vm368_vm0, %v1974_v25, 0.0  ;;  %v755_v33 = vpack.c.bf16 %v1974_v25, %v1974_v25  ;;  %v923_v34 = vsel %vm449_vm3, %v918_v30, 0  ;;  %1630 = vpow2.f32 %v896_v40 }
 0x417   : > { %1479 = vmatmul.mubr.msk.bf16.vlgmr.msra.gmra.mrb[12].mxu0 %vm368_vm0, %v597_v23 }
 0x418   : > { %1489 = vmatpush3.bf16.msra.mxu0 %v765_v24  ;;  %1490 = vmatprep.mubr.msk.bf16.mxu0 %vm1729_vm1, %v1728_v0 }
 0x419   : > { %1500 = vmatprep.subr.bf16.mxu0 %v1728_v0 }
 0x41a   : > { %752 = vadd.xlane.f32.xlu0 %v751_v27 }
 0x41c   : > { %v1982_v31 = vpop.eup %1622 }
 0x41d   : > { %v909_v32 = vsel %vm368_vm0, %v1982_v31, 0.0  ;;  %v913_v38 = vpack.c.bf16 %v1982_v31, %v1982_v31  ;;  %v1625_v41 = vpop.eup %1624 }
 0x41e   : > { %910 = vadd.xlane.f32.xlu1 %v909_v32  ;;  %v1627_v43 = vpop.eup %1626  ;;  %v592_v52 = vmul.f32 %v1625_v41, %v591_v51 }
 0x41f   : > { %1491 = vmatmul.mubr.msk.bf16.vlgmr.msra.gmra.mrb[16].mxu0 %vm368_vm0, %v755_v33  ;;  %v1629_v26 = vpop.eup %1628  ;;  %v440_v46 = vmul.f32 %v1627_v43, %v439_v29  ;;  %v808_v33 = vld [vmem:[#allocation4 + $0x10] sm:$0xff] }
 0x420   : > { %1501 = vmatpush3.bf16.msra.mxu0 %v923_v34  ;;  %1502 = vmatprep.mubr.msk.bf16.mxu0 %vm1729_vm1, %v1728_v0  ;;  %v1631_v28 = vpop.eup %1630  ;;  %v750_v56 = vmul.f32 %v1629_v26, %v749_v54 }
 0x421   : > { %v908_v60 = vmul.f32 %v1631_v28, %v907_v58 }
 0x427   : > { %1503 = vmatmul.mubr.msk.bf16.vlgmr.msra.gmra.mrb[20].mxu0 %vm368_vm0, %v913_v38 }
 0x42f   : > { %653 = vperm.xlu1 %1606, %v1625_v41  }
 0x430   : > { %496 = vperm.xlu0 %1605, %v1627_v43   ;;  %v966_v43 = vld [vmem:[#allocation4 + $0x18] sm:$0xff] }
 0x434   : > { %811 = vperm.xlu0 %1605, %v1629_v26  }
 0x438   : > { %969 = vperm.xlu0 %1605, %v1631_v28  }
 0x447   : > { %v443_v42 = vpop.xlane.xlu1 %442 }
 0x448   : > { %v444_v44 = vadd.f32 %v443_v42, %v440_v46 }
 0x44a   : > { %504 = vst.msk [vmem:[#allocation3] sm:$0xff] %vm359_vm2, %v444_v44 }
 0x451   : > { %v993_v45 = vld [vmem:[#allocation3] sm:$0xff] }
 0x452   : > { %1632 = vrcp.f32 %v993_v45 }
 0x45c   : > { %v1633_v47 = vpop.eup %1632 }
 0x45d   : > { %997 = vperm.xlu1 %1606, %v1633_v47  }
 0x4a3   : > { %v595_v53 = vpop.xlane.xlu0 %594 }
 0x4a4   : > { %v596_v55 = vadd.f32 %v595_v53, %v592_v52  ;;  %v1131_v53 = vsel %vm449_vm3, %v1426_v49, 0 }
 0x4a6   : > { %660 = vst.msk [vmem:[#allocation3 + $0x8] sm:$0xff] %vm359_vm2, %v596_v55 }
 0x4a7   : > { %v753_v57 = vpop.xlane.xlu0 %752 }
 0x4a8   : > { %v754_v59 = vadd.f32 %v753_v57, %v750_v56 }
 0x4aa   : > { %818 = vst.msk [vmem:[#allocation3 + $0x10] sm:$0xff] %vm359_vm2, %v754_v59 }
 0x4ab   : > { %v911_v61 = vpop.xlane.xlu1 %910 }
 0x4ac   : > { %v912_v62 = vadd.f32 %v911_v61, %v908_v60 }
 0x4ad   : > { %v1057_v1 = vld [vmem:[#allocation3 + $0x8] sm:$0xff] }
 0x4ae   : > { %976 = vst.msk [vmem:[#allocation3 + $0x18] sm:$0xff] %vm359_vm2, %v912_v62  ;;  %1634 = vrcp.f32 %v1057_v1 }
 0x4af   : > { %v497_v2 = vpop.permute.xlu0 %496  ;;  %v654_v13 = vpop.permute.xlu1 %653 }
 0x4b0   : > { %v499_v3 = vmul.f32 %v497_v2, %v493_v63  ;;  %v656_v22 = vmul.f32 %v654_v13, %v650_v20 }
 0x4b1   : > { %v1116_v4 = vld [vmem:[#allocation3 + $0x10] sm:$0xff] }
 0x4b2   : > { %v500_v5 = vadd.f32 %v499_v3, %v1946_v50  ;;  %1636 = vrcp.f32 %v1116_v4 }
 0x4b3   : > { %v812_v34 = vpop.permute.xlu0 %811 }
 0x4b4   : > { %501 = vst.msk [vmem:[#allocation4] sm:$0xff] %vm368_vm0, %v500_v5  ;;  %v814_v35 = vmul.f32 %v812_v34, %v808_v33 }
 0x4b5   : > { %v1175_v6 = vld [vmem:[#allocation3 + $0x18] sm:$0xff] }
 0x4b6   : > { %1638 = vrcp.f32 %v1175_v6 }
 0x4b7   : > { %1640 = vrcp.f32 %v444_v44  ;;  %v970_v26 = vpop.permute.xlu0 %969 }
 0x4b8   : > { %v1635_v7 = vpop.eup %1634  ;;  %1642 = vrcp.f32 %v596_v55  ;;  %v972_v28 = vmul.f32 %v970_v26, %v966_v43 }
 0x4b9   : > { %1061 = vperm.xlu1 %1606, %v1635_v7   ;;  %1644 = vrcp.f32 %v754_v59 }
 0x4ba   : > { %1646 = vrcp.f32 %v912_v62  ;;  %v1428_v62 = vld [vmem:[%s2117_s3 + $0xc] sm:$0xf] }
 0x4bb   : > { %v992_v14 = vld [vmem:[#allocation4] sm:$0xff] }
 0x4bc   : > { %v1637_v8 = vpop.eup %1636 }
 0x4bd   : > { %1120 = vperm.xlu1 %1606, %v1637_v8  }
 0x4c0   : > { %v1639_v9 = vpop.eup %1638 }
 0x4c1   : > { %v1641_v10 = vpop.eup %1640  ;;  %1179 = vperm.xlu0 %1605, %v1639_v9  }
 0x4c2   : > { %508 = vperm.xlu1 %1606, %v1641_v10   ;;  %v1643_v11 = vpop.eup %1642 }
 0x4c3   : > { %v1645_v12 = vpop.eup %1644 }
 0x4c4   : > { %v1647_v50 = vpop.eup %1646 }
 0x4c5   : > { %664 = vperm.xlu0 %1605, %v1643_v11  }
 0x4c6   : > { %822 = vperm.xlu1 %1606, %v1645_v12  }
 0x4c9   : > { %980 = vperm.xlu0 %1605, %v1647_v50  }
 0x4dc   : > { %v998_v15 = vpop.permute.xlu1 %997 }
 0x4dd   : > { %v1000_v17 = vmul.f32 %v998_v15, %v992_v14 }
 0x4df   : > { %v1001_v18 = vpack.c.bf16 %v1000_v17, %v1000_v17 }
 0x4e1   : > { %1509 = vmatmul.mubr.msk.bf16.vlgmr.msra.gmra.mrb[8].mxu1 %vm368_vm0, %v1001_v18 }
 0x4e2   : > { %1513 = vmatpush3.bf16.msra.mxu1 %v1072_v19  ;;  %1514 = vmatprep.mubr.msk.bf16.mxu1 %vm1729_vm1, %v1728_v0 }
 0x4e3   : > { %1518 = vmatprep.subr.bf16.mxu1 %v1728_v0 }
 0x4ea   : > { %v643_v23 = vpop.f32.mrb[12].mxu0 }
 0x4eb   : > { %v657_v24 = vadd.f32 %v656_v22, %v643_v23  ;;  %v1480_v27 = vpop.f32.mrb[13].mxu0 }
 0x4ec   : > { %v646_v30 = vpop.f32.mrb[14].mxu0 }
 0x4ed   : > { %658 = vst.msk [vmem:[#allocation4 + $0x8] sm:$0xff] %vm368_vm0, %v657_v24  ;;  %v1481_v32 = vpop.f32.mrb[15].mxu0 }
 0x4f2   : > { %v801_v36 = vpop.f32.mrb[16].mxu0 }
 0x4f3   : > { %v815_v37 = vadd.f32 %v814_v35, %v801_v36  ;;  %v1492_v38 = vpop.f32.mrb[17].mxu0 }
 0x4f4   : > { %v804_v40 = vpop.f32.mrb[18].mxu0  ;;  %v1056_v48 = vld [vmem:[#allocation4 + $0x8] sm:$0xff] }
 0x4f5   : > { %816 = vst.msk [vmem:[#allocation4 + $0x10] sm:$0xff] %vm368_vm0, %v815_v37  ;;  %v1493_v41 = vpop.f32.mrb[19].mxu0 }
 0x4fa   : > { %v959_v29 = vpop.f32.mrb[20].mxu0 }
 0x4fb   : > { %v973_v46 = vadd.f32 %v972_v28, %v959_v29  ;;  %v1504_v42 = vpop.f32.mrb[21].mxu0 }
 0x4fc   : > { %v962_v44 = vpop.f32.mrb[22].mxu0  ;;  %v1115_v58 = vld [vmem:[#allocation4 + $0x10] sm:$0xff] }
 0x4fd   : > { %974 = vst.msk [vmem:[#allocation4 + $0x18] sm:$0xff] %vm368_vm0, %v973_v46  ;;  %v1505_v45 = vpop.f32.mrb[23].mxu0 }
 0x504   : > { %v1174_v5 = vld [vmem:[#allocation4 + $0x18] sm:$0xff] }
 0x538   : > { %v1062_v47 = vpop.permute.xlu1 %1061 }
 0x539   : > { %v1064_v51 = vmul.f32 %v1062_v47, %v1056_v48 }
 0x53b   : > { %v1065_v52 = vpack.c.bf16 %v1064_v51, %v1064_v51 }
 0x53c   : > { %v1121_v54 = vpop.permute.xlu1 %1120 }
 0x53d   : > { %1515 = vmatmul.mubr.msk.bf16.vlgmr.msra.gmra.mrb[8].mxu1 %vm368_vm0, %v1065_v52  ;;  %v1123_v59 = vmul.f32 %v1121_v54, %v1115_v58 }
 0x53e   : > { %1519 = vmatpush3.bf16.msra.mxu1 %v1131_v53  ;;  %1520 = vmatprep.mubr.msk.bf16.mxu1 %vm1729_vm1, %v1728_v0 }
 0x53f   : > { %1524 = vmatprep.subr.bf16.mxu1 %v1728_v0  ;;  %v1124_v63 = vpack.c.bf16 %v1123_v59, %v1123_v59 }
 0x540   : > { %v1180_v55 = vpop.permute.xlu0 %1179 }
 0x541   : > { %v509_v56 = vpop.permute.xlu1 %508  ;;  %v1182_v7 = vmul.f32 %v1180_v55, %v1174_v5 }
 0x542   : > { %v511_v57 = vmul.f32 %v1924_v39, %v509_v56  ;;  %v1190_v39 = vsel %vm449_vm3, %v1428_v62, 0 }
 0x543   : > { %v1183_v8 = vpack.c.bf16 %v1182_v7, %v1182_v7 }
 0x544   : > { %v512_v60 = vmul.f32 0.25, %v511_v57  ;;  %v665_v61 = vpop.permute.xlu0 %664 }
 0x545   : > { %v667_v1 = vmul.f32 %v1967_v21, %v665_v61  ;;  %v823_v6 = vpop.permute.xlu1 %822 }
 0x546   : > { %513 = vst.msk [vmem:[%s2038_s28] sm:$0xff] %vm368_vm0, %v512_v60  ;;  %v825_v21 = vmul.f32 %v1974_v25, %v823_v6 }
 0x547   : > { %v668_v2 = vmul.f32 0.25, %v667_v1 }
 0x548   : > { %v826_v9 = vmul.f32 0.25, %v825_v21  ;;  %v981_v11 = vpop.permute.xlu0 %980 }
 0x549   : > { %1521 = vmatmul.mubr.msk.bf16.vlgmr.msra.gmra.mrb[8].mxu1 %vm368_vm0, %v1124_v63  ;;  %v983_v12 = vmul.f32 %v1982_v31, %v981_v11 }
 0x54a   : > { %1525 = vmatpush3.bf16.msra.mxu1 %v1190_v39  ;;  %1526 = vmatprep.mubr.msk.bf16.mxu1 %vm1729_vm1, %v1728_v0 }
 0x54b   : > { %v984_v50 = vmul.f32 0.25, %v983_v12 }
 0x54d   : > { %v669_v3 = vld [vmem:[%s2038_s28] sm:$0xff] }
 0x54e   : > { %v670_v4 = vadd.f32 %v669_v3, %v668_v2 }
 0x550   : > { %671 = vst.msk [vmem:[%s2038_s28] sm:$0xff] %vm368_vm0, %v670_v4 }
 0x555   : > { %1527 = vmatmul.mubr.msk.bf16.vlgmr.msra.gmra.mrb[8].mxu1 %vm368_vm0, %v1183_v8 }
 0x557   : > { %v827_v0 = vld [vmem:[%s2038_s28] sm:$0xff] }
 0x558   : > { %v828_v10 = vadd.f32 %v827_v0, %v826_v9 }
 0x55a   : > { %829 = vst.msk [vmem:[%s2038_s28] sm:$0xff] %vm368_vm0, %v828_v10 }
 0x561   : > { %v985_v13 = vld [vmem:[%s2038_s28] sm:$0xff] }
 0x562   : > { %v986_v14 = vadd.f32 %v985_v13, %v984_v50 }
 0x564   : > { %987 = vst.msk [vmem:[%s2038_s28] sm:$0xff] %vm368_vm0, %v986_v14 }
 0x565   : > { %1661 = shalt.err (!%p1658_p5)
}
 0x566   : > { %s1662_s24 = scalar_lea.hbm %s2064_s14, 128  ;;  %s1666_s28 = scalar_lea.hbm %s2120_s6, 256 }
 0x567   : > { %p1663_p6 = scmp.ne.s32.totalorder %s2064_s14, %s1662_s24  ;;  %p1667_p10 = scmp.lt.u32.totalorder %s2064_s14, %s2120_s6 }
 0x568   : > { %p1668_p11 = scmp.lt.u32.totalorder %s1666_s28, %s1662_s24  ;;  %p1670_p13 = scmp.lt.u32.totalorder %s1662_s24, %s2064_s14 }
 0x569   : > { %p1664_p7 = pnand %p1663_p6, %p1811_p4 }
 0x56a   : > { %p1669_p12 = por %p1668_p11, %p1667_p10 }
 0x56b   : > { %p1665_p9 = pneg %p1664_p7 }
 0x56c   : > { %p1671_p0 = por %p1670_p13, %p1669_p12 }
 0x56e   : > { %p1672_p1 = pnand %p1671_p0, %p1665_p9 }
 0x570   : > { %1675 = shalt.err (!%p1672_p1)
}
 0x571   : > { %1543 = dma.vmem_to_hbm [thread:$0]  (%p1811_p4), %s1261_s8, 128, %s2064_s14, %s1243_s15   ;;  %v1423_v25 = vld [vmem:[%s2118_s4] ss:$0 sm:$0xff]  ;;  %vm1233_vm4 = vcmask 261120  }
 0x572   : > { %s1404_s13 = sshll.u32 %s1839_s11, 3 }
 0x573   : > { %s353_s18 = scalar_lea.vmem %s2119_s5, %s1404_s13 }
 0x628   : > { %v1226_v31 = vpop.f32.mrb[8].mxu1 }
 0x629   : > { %v1530_v15 = vadd.f32 %v1423_v25, %v1226_v31  ;;  %v1528_v16 = vpop.f32.mrb[9].mxu1 }
 0x62a   : > { %v1229_v17 = vpop.f32.mrb[10].mxu1 }
 0x62b   : > { %1234 = vst.msk [vmem:[%s353_s18] sm:$0xff] %vm1233_vm4, %v1530_v15  ;;  %v1529_v18 = vpop.f32.mrb[11].mxu1 }
 0x62c PF: > { %p1549_p4 = scmp.ge.s32.totalorder %s1726_s26, 2  ;;  %s1282_s7 = sand.u32 1, %s1706_s21  }
 0x62d   : > { %s1283_s11 = scalar_lea.sflag [#allocation6], %s1282_s7 }
 0x62e   : > { %p1546_p2 = pnand %p1549_p4, %p1818_p8 }
 0x630   : > { %1701 = dma.done.wait (!%p1546_p2), %s1283_s11, 128  }
 0x631   : > { %1703 = vsyncadd (!%p1546_p2), %s1283_s11, 4294967168  ;;  %s20_s26 = sadd.s32 1, %s1726_s26   ;;  %s2123_s21 = smov %s1710_s22 }
 0x632   : > { %p17_p3 = scmp.ge.s32.totalorder %s20_s26, 4   ;;  %s2124_s22 = smov %s1714_s23 }
 0x633   : > { %s2125_s23 = smov %s1824_s10  ;;  %s2126_s24 = smov %s1722_s25 }
 0x634   : > { %s2127_s25 = smov %s2129_s29  ;;  %19 = sbr.rel (!%p17_p3) target bundleno = 4 (0x4), region = 113 }
 0x63b   :  { %1288 = vsyncpa [#allocation6], 1 }
 0x63c   :  { %1290 = vsyncpa [#allocation6 + $0x1], 1 }

</bundles_post_ra>
